<compile_context>
chip_gen: v5e
topology: v5e:2x2
jax: 0.10.0
libtpu: 0.0.40
codegen_flags: <defaults>
</compile_context>

<pallas_src>
import math
import functools

import jax
import jax.numpy as jnp
from jax import lax
from jax.experimental import pallas as pl
from jax.experimental.pallas import tpu as pltpu

EMBED_DIM = 32
NUM_HEADS = 4
HEAD_DIM = EMBED_DIM // NUM_HEADS

# q @ k^T: contract last dim of both operands (MXU handles NT natively).
_NT_DIM_NUMBERS = (((1,), (1,)), ((), ()))


# ----------------------------- fused Pallas kernel ------------------------- #

def _fused_mha_kernel(q_ref, k_ref, v_ref, bias_ref, w_ref, b_ref,
                      o_ref, acc_ref, *, n_batch, n_heads, head_dim):
    """Whole MHA forward (all batches & heads) in one invocation.

    q_ref:    (Lq*N, E)  seq-major flattened queries
    k_ref:    (S*N, E)   seq-major flattened keys
    v_ref:    (S*N, E)   seq-major flattened values
    bias_ref: (1, S*N)   additive key-padding bias (-1e30 where masked),
                         column order matches k_ref's row order
    w_ref:    (4, E, E)  [wq^T * scale, wk^T, wv^T, wo^T]
    b_ref:    (4, E)     [bq * scale, bk, bv, bo]
    o_ref:    (Lq*N, E)  output
    acc_ref:  (Lq*N, E)  VMEM scratch holding the merged per-head outputs
    """
    lq_n = q_ref.shape[0]
    s_n = k_ref.shape[0]

    # In-projections: one MXU push each, covering both batches at once.
    qp = jnp.dot(q_ref[...], w_ref[0],
                 preferred_element_type=jnp.float32) + b_ref[0:1, :]
    kp = jnp.dot(k_ref[...], w_ref[1],
                 preferred_element_type=jnp.float32) + b_ref[1:2, :]
    vp = jnp.dot(v_ref[...], w_ref[2],
                 preferred_element_type=jnp.float32) + b_ref[2:3, :]

    # Additive bias (Lq*N, S*N): key-padding bias on same-batch entries,
    # -1e30 on cross-batch entries (block structure over interleaved rows).
    row_b = lax.broadcasted_iota(jnp.int32, (lq_n, s_n), 0) % n_batch
    col_b = lax.broadcasted_iota(jnp.int32, (lq_n, s_n), 1) % n_batch
    bias = jnp.where(row_b == col_b, bias_ref[...], jnp.float32(-1e30))

    for h in range(n_heads):                           # H = 4, unrolled
        lo = h * head_dim
        hi = lo + head_dim
        s = lax.dot_general(qp[:, lo:hi], kp[:, lo:hi], _NT_DIM_NUMBERS,
                            preferred_element_type=jnp.float32) + bias
        m = jnp.max(s, axis=-1, keepdims=True)
        p = jnp.exp(s - m)
        denom = jnp.sum(p, axis=-1, keepdims=True)
        attn = jnp.dot(p, vp[:, lo:hi], preferred_element_type=jnp.float32)
        # fold 1/denom into the (Lq*N, hd) result instead of dividing p
        acc_ref[:, lo:hi] = attn * pl.reciprocal(denom, approx=False)

    # Single out-projection over all heads & batches + single output store.
    o_ref[...] = (jnp.dot(acc_ref[...], w_ref[3],
                          preferred_element_type=jnp.float32) + b_ref[3:4, :])


# ---------------------------- parameter prep (one-time) -------------------- #

def prepare_params(w_in, b_in, w_out, b_out):
    """One-time repack of nn.MultiheadAttention params (runs OUTSIDE jit)."""
    E = w_out.shape[0]
    scale = 1.0 / math.sqrt(E // NUM_HEADS)
    w_all = jnp.stack([
        (w_in[:E] * scale).T,        # wq^T with softmax scale folded in
        w_in[E:2 * E].T,             # wk^T
        w_in[2 * E:].T,              # wv^T
        w_out.T,                     # wo^T
    ]).astype(jnp.float32)           # (4, E, E)
    b_all = jnp.stack([
        b_in[:E] * scale, b_in[E:2 * E], b_in[2 * E:], b_out,
    ]).astype(jnp.float32)           # (4, E)
    return w_all, b_all


# ---------------------------- Model forward -------------------------------- #

@jax.jit
def mha_forward(q, k, v, key_padding_mask, w_all, b_all):
    """Equivalent of torch.nn.MultiheadAttention(E, H)(q, k, v, key_padding_mask)[0].

    q: (Lq, N, E), k/v: (S, N, E), key_padding_mask: (N, S) bool (True = ignore).
    Returns: (Lq, N, E).
    """
    Lq, N, E = q.shape
    S = k.shape[0]

    # Free contiguous reshapes — no transposes around the custom call.
    qf = q.reshape(Lq * N, E).astype(jnp.float32)
    kf = k.reshape(S * N, E).astype(jnp.float32)
    vf = v.reshape(S * N, E).astype(jnp.float32)

    # key_padding_mask (N, S) -> additive column bias in the interleaved
    # (seq-major) key order; the only per-call wrapper compute (20 elements).
    bias_cols = (key_padding_mask.T.astype(jnp.float32)
                 * jnp.float32(-1e30)).reshape(1, S * N)

    kernel = functools.partial(_fused_mha_kernel, n_batch=N,
                               n_heads=NUM_HEADS, head_dim=HEAD_DIM)
    vmem = pltpu.MemorySpace.VMEM
    out = pl.pallas_call(
        kernel,
        out_shape=jax.ShapeDtypeStruct((Lq * N, E), jnp.float32),
        in_specs=[pl.BlockSpec(memory_space=vmem) for _ in range(6)],
        out_specs=pl.BlockSpec(memory_space=vmem),
        scratch_shapes=[pltpu.VMEM((Lq * N, E), jnp.float32)],
    )(qf, kf, vf, bias_cols, w_all, b_all)

    return out.reshape(Lq, N, E)                      # (Lq, N, E), free reshape


def mha_reference(q, k, v, key_padding_mask, params):
    """Pure-jnp reference with PyTorch's math, for correctness check."""
    w_in, b_in, w_out, b_out = params
    Lq, N, E = q.shape
    S = k.shape[0]
    H, hd = NUM_HEADS, HEAD_DIM
    qp = q.reshape(Lq * N, E) @ w_in[:E].T + b_in[:E]
    kp = k.reshape(S * N, E) @ w_in[E:2 * E].T + b_in[E:2 * E]
    vp = v.reshape(S * N, E) @ w_in[2 * E:].T + b_in[2 * E:]
    qh = qp.reshape(Lq, N, H, hd).transpose(1, 2, 0, 3).reshape(N * H, Lq, hd)
    kh = kp.reshape(S, N, H, hd).transpose(1, 2, 0, 3).reshape(N * H, S, hd)
    vh = vp.reshape(S, N, H, hd).transpose(1, 2, 0, 3).reshape(N * H, S, hd)
    bias = jnp.where(key_padding_mask[:, None, None, :], -jnp.inf, 0.0)
    bias = jnp.broadcast_to(bias, (N, H, Lq, S)).reshape(N * H, Lq, S)
    scores = jnp.einsum("bqd,bkd->bqk", qh, kh) / math.sqrt(hd) + bias
    probs = jax.nn.softmax(scores, axis=-1)
    attn = jnp.einsum("bqk,bkd->bqd", probs, vh)
    merged = attn.reshape(N, H, Lq, hd).transpose(2, 0, 1, 3).reshape(Lq * N, E)
    return (merged @ w_out.T + b_out).reshape(Lq, N, E)


# --------------------------------- main ------------------------------------ #

if __name__ == "__main__":
    key = jax.random.PRNGKey(0)
    k_q, k_k, k_v, k_win, k_bin, k_wout, k_bout = jax.random.split(key, 7)

    Lq, S, N, E = 20, 10, 2, EMBED_DIM

    # inputs (seq-first, matching nn.MultiheadAttention's default layout)
    q1 = jax.random.normal(k_q, (Lq, N, E), dtype=jnp.float32)
    k1 = jax.random.normal(k_k, (S, N, E), dtype=jnp.float32)
    v1 = jax.random.normal(k_v, (S, N, E), dtype=jnp.float32)
    # key_padding_mask: (N, S) bool, True = masked; keep >=1 valid key per row
    lens = jnp.array([7, 5], dtype=jnp.int32)
    mask = jnp.arange(S)[None, :] >= lens[:, None]

    # deterministic parameter init (shapes from nn.MultiheadAttention(32, 4))
    w_in = 0.1 * jax.random.normal(k_win, (3 * E, E), dtype=jnp.float32)
    b_in = 0.1 * jax.random.normal(k_bin, (3 * E,), dtype=jnp.float32)
    w_out = 0.1 * jax.random.normal(k_wout, (E, E), dtype=jnp.float32)
    b_out = 0.1 * jax.random.normal(k_bout, (E,), dtype=jnp.float32)
    params = (w_in, b_in, w_out, b_out)

    # one-time weight prep (outside the jitted per-call path)
    w_all, b_all = prepare_params(w_in, b_in, w_out, b_out)

    out = mha_forward(q1, k1, v1, mask, w_all, b_all)
    out = jax.block_until_ready(out)

    ref = mha_reference(q1, k1, v1, mask, params)
    assert out.shape == (Lq, N, E)
    assert jnp.allclose(out, ref, atol=1e-4, rtol=1e-4), "mismatch vs reference"

    print("KERNEL_OK")
</pallas_src>

<mosaic_0001>
module attributes {stable_mosaic.version = 11 : i64} {
  func.func @_fused_mha_kernel(%arg0: memref<40x32xf32, #tpu.memory_space<vmem>>, %arg1: memref<20x32xf32, #tpu.memory_space<vmem>>, %arg2: memref<20x32xf32, #tpu.memory_space<vmem>>, %arg3: memref<1x20xf32, #tpu.memory_space<vmem>>, %arg4: memref<4x32x32xf32, #tpu.memory_space<vmem>>, %arg5: memref<4x32xf32, #tpu.memory_space<vmem>>, %arg6: memref<40x32xf32, #tpu.memory_space<vmem>>, %arg7: memref<40x32xf32, #tpu.memory_space<vmem>>) attributes {dimension_semantics = [], scalar_prefetch = 0 : i64, scratch_operands = 1 : i64, tpu.core_type = #tpu.core_type<tc>} {
    %c0 = arith.constant 0 : index
    %c0_0 = arith.constant 0 : index
    %0 = vector.load %arg0[%c0, %c0_0] : memref<40x32xf32, #tpu.memory_space<vmem>>, vector<40x32xf32>
    %c0_1 = arith.constant 0 : index
    %c0_2 = arith.constant 0 : index
    %c0_3 = arith.constant 0 : index
    %1 = vector.load %arg4[%c0_1, %c0_2, %c0_3] : memref<4x32x32xf32, #tpu.memory_space<vmem>>, vector<1x32x32xf32>
    %2 = vector.shape_cast %1 : vector<1x32x32xf32> to vector<32x32xf32>
    %cst = arith.constant dense<0.000000e+00> : vector<40x32xf32>
    %3 = tpu.matmul %0, %2, %cst {dimension_numbers = #tpu.dot_dimension_numbers<[1], [0], [0], [1], [0, 0, 1, 1], [], []>} : vector<40x32xf32>, vector<32x32xf32>, vector<40x32xf32> -> vector<40x32xf32>
    %c0_4 = arith.constant 0 : index
    %c0_5 = arith.constant 0 : index
    %4 = vector.load %arg5[%c0_4, %c0_5] : memref<4x32xf32, #tpu.memory_space<vmem>>, vector<1x32xf32>
    %5 = vector.broadcast %4 : vector<1x32xf32> to vector<40x32xf32>
    %6 = arith.addf %3, %5 : vector<40x32xf32>
    %c0_6 = arith.constant 0 : index
    %c0_7 = arith.constant 0 : index
    %7 = vector.load %arg1[%c0_6, %c0_7] : memref<20x32xf32, #tpu.memory_space<vmem>>, vector<20x32xf32>
    %c1 = arith.constant 1 : index
    %c0_8 = arith.constant 0 : index
    %c0_9 = arith.constant 0 : index
    %8 = vector.load %arg4[%c1, %c0_8, %c0_9] : memref<4x32x32xf32, #tpu.memory_space<vmem>>, vector<1x32x32xf32>
    %9 = vector.shape_cast %8 : vector<1x32x32xf32> to vector<32x32xf32>
    %cst_10 = arith.constant dense<0.000000e+00> : vector<20x32xf32>
    %10 = tpu.matmul %7, %9, %cst_10 {dimension_numbers = #tpu.dot_dimension_numbers<[1], [0], [0], [1], [0, 0, 1, 1], [], []>} : vector<20x32xf32>, vector<32x32xf32>, vector<20x32xf32> -> vector<20x32xf32>
    %c1_11 = arith.constant 1 : index
    %c0_12 = arith.constant 0 : index
    %11 = vector.load %arg5[%c1_11, %c0_12] : memref<4x32xf32, #tpu.memory_space<vmem>>, vector<1x32xf32>
    %12 = vector.broadcast %11 : vector<1x32xf32> to vector<20x32xf32>
    %13 = arith.addf %10, %12 : vector<20x32xf32>
    %c0_13 = arith.constant 0 : index
    %c0_14 = arith.constant 0 : index
    %14 = vector.load %arg2[%c0_13, %c0_14] : memref<20x32xf32, #tpu.memory_space<vmem>>, vector<20x32xf32>
    %c2 = arith.constant 2 : index
    %c0_15 = arith.constant 0 : index
    %c0_16 = arith.constant 0 : index
    %15 = vector.load %arg4[%c2, %c0_15, %c0_16] : memref<4x32x32xf32, #tpu.memory_space<vmem>>, vector<1x32x32xf32>
    %16 = vector.shape_cast %15 : vector<1x32x32xf32> to vector<32x32xf32>
    %cst_17 = arith.constant dense<0.000000e+00> : vector<20x32xf32>
    %17 = tpu.matmul %14, %16, %cst_17 {dimension_numbers = #tpu.dot_dimension_numbers<[1], [0], [0], [1], [0, 0, 1, 1], [], []>} : vector<20x32xf32>, vector<32x32xf32>, vector<20x32xf32> -> vector<20x32xf32>
    %c2_18 = arith.constant 2 : index
    %c0_19 = arith.constant 0 : index
    %18 = vector.load %arg5[%c2_18, %c0_19] : memref<4x32xf32, #tpu.memory_space<vmem>>, vector<1x32xf32>
    %19 = vector.broadcast %18 : vector<1x32xf32> to vector<20x32xf32>
    %20 = arith.addf %17, %19 : vector<20x32xf32>
    %21 = tpu.iota {dimensions = array<i32: 0>} : vector<40x20xi32>
    %c2_i32 = arith.constant 2 : i32
    %c0_i32 = arith.constant 0 : i32
    %22 = arith.cmpi eq, %c2_i32, %c0_i32 : i32
    %c1_i32 = arith.constant 1 : i32
    %23 = arith.select %22, %c1_i32, %c2_i32 : i32
    %24 = vector.broadcast %23 : i32 to vector<40x20xi32>
    %25 = arith.remsi %21, %24 : vector<40x20xi32>
    %c0_i32_20 = arith.constant 0 : i32
    %26 = vector.broadcast %c0_i32_20 : i32 to vector<40x20xi32>
    %27 = arith.cmpi ne, %25, %26 : vector<40x20xi32>
    %c0_i32_21 = arith.constant 0 : i32
    %28 = vector.broadcast %c0_i32_21 : i32 to vector<40x20xi32>
    %29 = arith.cmpi slt, %25, %28 : vector<40x20xi32>
    %c0_i32_22 = arith.constant 0 : i32
    %30 = arith.cmpi slt, %23, %c0_i32_22 : i32
    %31 = vector.broadcast %30 : i1 to vector<40x20xi1>
    %32 = vector.broadcast %31 : vector<40x20xi1> to vector<40x20xi1>
    %33 = arith.xori %29, %32 : vector<40x20xi1>
    %34 = arith.andi %33, %27 : vector<40x20xi1>
    %35 = vector.broadcast %23 : i32 to vector<40x20xi32>
    %36 = arith.addi %25, %35 : vector<40x20xi32>
    %37 = arith.select %34, %36, %25 : vector<40x20xi1>, vector<40x20xi32>
    %38 = tpu.iota {dimensions = array<i32: 1>} : vector<40x20xi32>
    %c2_i32_23 = arith.constant 2 : i32
    %c0_i32_24 = arith.constant 0 : i32
    %39 = arith.cmpi eq, %c2_i32_23, %c0_i32_24 : i32
    %c1_i32_25 = arith.constant 1 : i32
    %40 = arith.select %39, %c1_i32_25, %c2_i32_23 : i32
    %41 = vector.broadcast %40 : i32 to vector<40x20xi32>
    %42 = arith.remsi %38, %41 : vector<40x20xi32>
    %c0_i32_26 = arith.constant 0 : i32
    %43 = vector.broadcast %c0_i32_26 : i32 to vector<40x20xi32>
    %44 = arith.cmpi ne, %42, %43 : vector<40x20xi32>
    %c0_i32_27 = arith.constant 0 : i32
    %45 = vector.broadcast %c0_i32_27 : i32 to vector<40x20xi32>
    %46 = arith.cmpi slt, %42, %45 : vector<40x20xi32>
    %c0_i32_28 = arith.constant 0 : i32
    %47 = arith.cmpi slt, %40, %c0_i32_28 : i32
    %48 = vector.broadcast %47 : i1 to vector<40x20xi1>
    %49 = vector.broadcast %48 : vector<40x20xi1> to vector<40x20xi1>
    %50 = arith.xori %46, %49 : vector<40x20xi1>
    %51 = arith.andi %50, %44 : vector<40x20xi1>
    %52 = vector.broadcast %40 : i32 to vector<40x20xi32>
    %53 = arith.addi %42, %52 : vector<40x20xi32>
    %54 = arith.select %51, %53, %42 : vector<40x20xi1>, vector<40x20xi32>
    %55 = arith.cmpi eq, %37, %54 : vector<40x20xi32>
    %c0_29 = arith.constant 0 : index
    %c0_30 = arith.constant 0 : index
    %56 = vector.load %arg3[%c0_29, %c0_30] : memref<1x20xf32, #tpu.memory_space<vmem>>, vector<1x20xf32>
    %cst_31 = arith.constant -1.000000e+30 : f32
    %57 = vector.shape_cast %56 : vector<1x20xf32> to vector<1x20xf32>
    %58 = vector.broadcast %57 : vector<1x20xf32> to vector<40x20xf32>
    %59 = vector.broadcast %cst_31 : f32 to vector<40x20xf32>
    %60 = arith.select %55, %58, %59 : vector<40x20xi1>, vector<40x20xf32>
    %61 = vector.extract_strided_slice %6 {offsets = [0, 0], sizes = [40, 8], strides = [1, 1]} : vector<40x32xf32> to vector<40x8xf32>
    %62 = vector.extract_strided_slice %13 {offsets = [0, 0], sizes = [20, 8], strides = [1, 1]} : vector<20x32xf32> to vector<20x8xf32>
    %cst_32 = arith.constant dense<0.000000e+00> : vector<40x20xf32>
    %63 = tpu.matmul %61, %62, %cst_32 {dimension_numbers = #tpu.dot_dimension_numbers<[1], [1], [0], [0], [0, 0, 1, 0], [], []>} : vector<40x8xf32>, vector<20x8xf32>, vector<40x20xf32> -> vector<40x20xf32>
    %64 = arith.addf %63, %60 : vector<40x20xf32>
    %cst_33 = arith.constant dense<0xFF800000> : vector<40xf32>
    %65 = vector.multi_reduction <maximumf>, %64, %cst_33 [1] : vector<40x20xf32> to vector<40xf32>
    %66 = vector.shape_cast %65 : vector<40xf32> to vector<40x1xf32>
    %67 = vector.broadcast %66 : vector<40x1xf32> to vector<40x20xf32>
    %68 = arith.subf %64, %67 : vector<40x20xf32>
    %69 = math.exp %68 : vector<40x20xf32>
    %cst_34 = arith.constant dense<0.000000e+00> : vector<40xf32>
    %70 = vector.multi_reduction <add>, %69, %cst_34 [1] : vector<40x20xf32> to vector<40xf32>
    %71 = vector.shape_cast %70 : vector<40xf32> to vector<40x1xf32>
    %72 = vector.extract_strided_slice %20 {offsets = [0, 0], sizes = [20, 8], strides = [1, 1]} : vector<20x32xf32> to vector<20x8xf32>
    %cst_35 = arith.constant dense<0.000000e+00> : vector<40x8xf32>
    %73 = tpu.matmul %69, %72, %cst_35 {dimension_numbers = #tpu.dot_dimension_numbers<[1], [0], [0], [1], [0, 0, 1, 1], [], []>} : vector<40x20xf32>, vector<20x8xf32>, vector<40x8xf32> -> vector<40x8xf32>
    %74 = tpu.reciprocal %71 : vector<40x1xf32> -> vector<40x1xf32>
    %75 = vector.broadcast %74 : vector<40x1xf32> to vector<40x8xf32>
    %76 = arith.mulf %73, %75 : vector<40x8xf32>
    %c0_36 = arith.constant 0 : index
    %c0_37 = arith.constant 0 : index
    %77 = vector.load %arg7[%c0_36, %c0_37] : memref<40x32xf32, #tpu.memory_space<vmem>>, vector<40x8xf32>
    tpu.vector_store %arg7[%c0_36, %c0_37], %76 {strides = array<i32>} : memref<40x32xf32, #tpu.memory_space<vmem>>, vector<40x8xf32>,
    %78 = vector.extract_strided_slice %6 {offsets = [0, 8], sizes = [40, 8], strides = [1, 1]} : vector<40x32xf32> to vector<40x8xf32>
    %79 = vector.extract_strided_slice %13 {offsets = [0, 8], sizes = [20, 8], strides = [1, 1]} : vector<20x32xf32> to vector<20x8xf32>
    %cst_38 = arith.constant dense<0.000000e+00> : vector<40x20xf32>
    %80 = tpu.matmul %78, %79, %cst_38 {dimension_numbers = #tpu.dot_dimension_numbers<[1], [1], [0], [0], [0, 0, 1, 0], [], []>} : vector<40x8xf32>, vector<20x8xf32>, vector<40x20xf32> -> vector<40x20xf32>
    %81 = arith.addf %80, %60 : vector<40x20xf32>
    %cst_39 = arith.constant dense<0xFF800000> : vector<40xf32>
    %82 = vector.multi_reduction <maximumf>, %81, %cst_39 [1] : vector<40x20xf32> to vector<40xf32>
    %83 = vector.shape_cast %82 : vector<40xf32> to vector<40x1xf32>
    %84 = vector.broadcast %83 : vector<40x1xf32> to vector<40x20xf32>
    %85 = arith.subf %81, %84 : vector<40x20xf32>
    %86 = math.exp %85 : vector<40x20xf32>
    %cst_40 = arith.constant dense<0.000000e+00> : vector<40xf32>
    %87 = vector.multi_reduction <add>, %86, %cst_40 [1] : vector<40x20xf32> to vector<40xf32>
    %88 = vector.shape_cast %87 : vector<40xf32> to vector<40x1xf32>
    %89 = vector.extract_strided_slice %20 {offsets = [0, 8], sizes = [20, 8], strides = [1, 1]} : vector<20x32xf32> to vector<20x8xf32>
    %cst_41 = arith.constant dense<0.000000e+00> : vector<40x8xf32>
    %90 = tpu.matmul %86, %89, %cst_41 {dimension_numbers = #tpu.dot_dimension_numbers<[1], [0], [0], [1], [0, 0, 1, 1], [], []>} : vector<40x20xf32>, vector<20x8xf32>, vector<40x8xf32> -> vector<40x8xf32>
    %91 = tpu.reciprocal %88 : vector<40x1xf32> -> vector<40x1xf32>
    %92 = vector.broadcast %91 : vector<40x1xf32> to vector<40x8xf32>
    %93 = arith.mulf %90, %92 : vector<40x8xf32>
    %c0_42 = arith.constant 0 : index
    %c8 = arith.constant 8 : index
    %94 = vector.load %arg7[%c0_42, %c8] : memref<40x32xf32, #tpu.memory_space<vmem>>, vector<40x8xf32>
    tpu.vector_store %arg7[%c0_42, %c8], %93 {strides = array<i32>} : memref<40x32xf32, #tpu.memory_space<vmem>>, vector<40x8xf32>,
    %95 = vector.extract_strided_slice %6 {offsets = [0, 16], sizes = [40, 8], strides = [1, 1]} : vector<40x32xf32> to vector<40x8xf32>
    %96 = vector.extract_strided_slice %13 {offsets = [0, 16], sizes = [20, 8], strides = [1, 1]} : vector<20x32xf32> to vector<20x8xf32>
    %cst_43 = arith.constant dense<0.000000e+00> : vector<40x20xf32>
    %97 = tpu.matmul %95, %96, %cst_43 {dimension_numbers = #tpu.dot_dimension_numbers<[1], [1], [0], [0], [0, 0, 1, 0], [], []>} : vector<40x8xf32>, vector<20x8xf32>, vector<40x20xf32> -> vector<40x20xf32>
    %98 = arith.addf %97, %60 : vector<40x20xf32>
    %cst_44 = arith.constant dense<0xFF800000> : vector<40xf32>
    %99 = vector.multi_reduction <maximumf>, %98, %cst_44 [1] : vector<40x20xf32> to vector<40xf32>
    %100 = vector.shape_cast %99 : vector<40xf32> to vector<40x1xf32>
    %101 = vector.broadcast %100 : vector<40x1xf32> to vector<40x20xf32>
    %102 = arith.subf %98, %101 : vector<40x20xf32>
    %103 = math.exp %102 : vector<40x20xf32>
    %cst_45 = arith.constant dense<0.000000e+00> : vector<40xf32>
    %104 = vector.multi_reduction <add>, %103, %cst_45 [1] : vector<40x20xf32> to vector<40xf32>
    %105 = vector.shape_cast %104 : vector<40xf32> to vector<40x1xf32>
    %106 = vector.extract_strided_slice %20 {offsets = [0, 16], sizes = [20, 8], strides = [1, 1]} : vector<20x32xf32> to vector<20x8xf32>
    %cst_46 = arith.constant dense<0.000000e+00> : vector<40x8xf32>
    %107 = tpu.matmul %103, %106, %cst_46 {dimension_numbers = #tpu.dot_dimension_numbers<[1], [0], [0], [1], [0, 0, 1, 1], [], []>} : vector<40x20xf32>, vector<20x8xf32>, vector<40x8xf32> -> vector<40x8xf32>
    %108 = tpu.reciprocal %105 : vector<40x1xf32> -> vector<40x1xf32>
    %109 = vector.broadcast %108 : vector<40x1xf32> to vector<40x8xf32>
    %110 = arith.mulf %107, %109 : vector<40x8xf32>
    %c0_47 = arith.constant 0 : index
    %c16 = arith.constant 16 : index
    %111 = vector.load %arg7[%c0_47, %c16] : memref<40x32xf32, #tpu.memory_space<vmem>>, vector<40x8xf32>
    tpu.vector_store %arg7[%c0_47, %c16], %110 {strides = array<i32>} : memref<40x32xf32, #tpu.memory_space<vmem>>, vector<40x8xf32>,
    %112 = vector.extract_strided_slice %6 {offsets = [0, 24], sizes = [40, 8], strides = [1, 1]} : vector<40x32xf32> to vector<40x8xf32>
    %113 = vector.extract_strided_slice %13 {offsets = [0, 24], sizes = [20, 8], strides = [1, 1]} : vector<20x32xf32> to vector<20x8xf32>
    %cst_48 = arith.constant dense<0.000000e+00> : vector<40x20xf32>
    %114 = tpu.matmul %112, %113, %cst_48 {dimension_numbers = #tpu.dot_dimension_numbers<[1], [1], [0], [0], [0, 0, 1, 0], [], []>} : vector<40x8xf32>, vector<20x8xf32>, vector<40x20xf32> -> vector<40x20xf32>
    %115 = arith.addf %114, %60 : vector<40x20xf32>
    %cst_49 = arith.constant dense<0xFF800000> : vector<40xf32>
    %116 = vector.multi_reduction <maximumf>, %115, %cst_49 [1] : vector<40x20xf32> to vector<40xf32>
    %117 = vector.shape_cast %116 : vector<40xf32> to vector<40x1xf32>
    %118 = vector.broadcast %117 : vector<40x1xf32> to vector<40x20xf32>
    %119 = arith.subf %115, %118 : vector<40x20xf32>
    %120 = math.exp %119 : vector<40x20xf32>
    %cst_50 = arith.constant dense<0.000000e+00> : vector<40xf32>
    %121 = vector.multi_reduction <add>, %120, %cst_50 [1] : vector<40x20xf32> to vector<40xf32>
    %122 = vector.shape_cast %121 : vector<40xf32> to vector<40x1xf32>
    %123 = vector.extract_strided_slice %20 {offsets = [0, 24], sizes = [20, 8], strides = [1, 1]} : vector<20x32xf32> to vector<20x8xf32>
    %cst_51 = arith.constant dense<0.000000e+00> : vector<40x8xf32>
    %124 = tpu.matmul %120, %123, %cst_51 {dimension_numbers = #tpu.dot_dimension_numbers<[1], [0], [0], [1], [0, 0, 1, 1], [], []>} : vector<40x20xf32>, vector<20x8xf32>, vector<40x8xf32> -> vector<40x8xf32>
    %125 = tpu.reciprocal %122 : vector<40x1xf32> -> vector<40x1xf32>
    %126 = vector.broadcast %125 : vector<40x1xf32> to vector<40x8xf32>
    %127 = arith.mulf %124, %126 : vector<40x8xf32>
    %c0_52 = arith.constant 0 : index
    %c24 = arith.constant 24 : index
    %128 = vector.load %arg7[%c0_52, %c24] : memref<40x32xf32, #tpu.memory_space<vmem>>, vector<40x8xf32>
    tpu.vector_store %arg7[%c0_52, %c24], %127 {strides = array<i32>} : memref<40x32xf32, #tpu.memory_space<vmem>>, vector<40x8xf32>,
    %c0_53 = arith.constant 0 : index
    %c0_54 = arith.constant 0 : index
    %129 = vector.load %arg7[%c0_53, %c0_54] : memref<40x32xf32, #tpu.memory_space<vmem>>, vector<40x32xf32>
    %c3 = arith.constant 3 : index
    %c0_55 = arith.constant 0 : index
    %c0_56 = arith.constant 0 : index
    %130 = vector.load %arg4[%c3, %c0_55, %c0_56] : memref<4x32x32xf32, #tpu.memory_space<vmem>>, vector<1x32x32xf32>
    %131 = vector.shape_cast %130 : vector<1x32x32xf32> to vector<32x32xf32>
    %cst_57 = arith.constant dense<0.000000e+00> : vector<40x32xf32>
    %132 = tpu.matmul %129, %131, %cst_57 {dimension_numbers = #tpu.dot_dimension_numbers<[1], [0], [0], [1], [0, 0, 1, 1], [], []>} : vector<40x32xf32>, vector<32x32xf32>, vector<40x32xf32> -> vector<40x32xf32>
    %c3_58 = arith.constant 3 : index
    %c0_59 = arith.constant 0 : index
    %133 = vector.load %arg5[%c3_58, %c0_59] : memref<4x32xf32, #tpu.memory_space<vmem>>, vector<1x32xf32>
    %134 = vector.broadcast %133 : vector<1x32xf32> to vector<40x32xf32>
    %135 = arith.addf %132, %134 : vector<40x32xf32>
    %c0_60 = arith.constant 0 : index
    %c0_61 = arith.constant 0 : index
    %136 = vector.load %arg6[%c0_60, %c0_61] : memref<40x32xf32, #tpu.memory_space<vmem>>, vector<40x32xf32>
    tpu.vector_store %arg6[%c0_60, %c0_61], %135 {strides = array<i32>} : memref<40x32xf32, #tpu.memory_space<vmem>>, vector<40x32xf32>,
    return
  }
}

</mosaic_0001>

<bundles_post_ra>
// kernel: mha_forward.1
= control target key start
LH: loop header
LB: loop body
LE: loop exit
PB: predicated region body
PF: predicated region fallthrough
CT: control target
= control target key end

     0   :  { %11 = vsyncpa [#allocation4], 0  ;;  %s2131_s0 = inlined_call_operand.vmem [shape: f32[40,32], index: 0, kind: input, shape index: {}]   ;;  %s2132_s1 = inlined_call_operand.vmem [shape: f32[20,32], index: 1, kind: input, shape index: {}]   ;;  %s2133_s2 = inlined_call_operand.vmem [shape: f32[20,32], index: 2, kind: input, shape index: {}]   ;;  %s2134_s3 = inlined_call_operand.vmem [shape: f32[1,20], index: 3, kind: input, shape index: {}]   ;;  %s2135_s4 = inlined_call_operand.hbm [shape: f32[4,32,32], index: 4, kind: input, shape index: {}]   ;;  %s2136_s5 = inlined_call_operand.vmem [shape: f32[4,32], index: 5, kind: input, shape index: {}]   ;;  %s2137_s6 = inlined_call_operand.hbm [shape: f32[40,32], index: 6, kind: output, shape index: {}]  }
   0x1   :  { %12 = vsyncpa [#allocation5], 0  ;;  %s25_s23 = sshll.u32 %s2135_s4, 4  ;;  %s1639_s24 = smov [#allocation3]   ;;  %s26_s23 = int_to_ptr.hbm [resolvable:$true] %s25_s23 }
   0x2   :  { %s27_s25 = sshll.u32 %s1639_s24, 4  ;;  %s1640_s26 = smov 128   ;;  %s28_s25 = int_to_ptr.vmem [resolvable:$true] %s27_s25 }
   0x3   :  { %s1641_s27 = smov 8  }
   0x4   :  { %33 = dma.hbm_to_vmem [thread:$0]  %s26_s23, 2048, %s28_s25, [#allocation4], %s1640_s26, %s1640_s26, %s1641_s27  }
   0x5   :  { %1635 = dma.done.wait [#allocation4], 2048  }
   0x6   :  { %1636 = vsyncadd [#allocation4], 4294965248  ;;  %v48_v0 = vld [vmem:[#allocation3 + $0x18] sm:$0xff]  ;;  %v47_v2 = vld [vmem:[#allocation3 + $0x10] sm:$0xff]  ;;  %vm51_vm0 = vcmask 261120   ;;  %vm283_vm1 = vcmask 64512   ;;  %v189_v56 = vlaneseq }
   0x7   :  { %v106_v1 = vld [vmem:[#allocation3 + $0x38] sm:$0xff]  ;;  %79 = vmatpush.msra.mxu0 %v48_v0  ;;  %v105_v3 = vld [vmem:[#allocation3 + $0x30] sm:$0xff]  ;;  %v46_v4 = vld [vmem:[#allocation3 + $0x8] sm:$0xff]  ;;  %s1644_s29 = smov 104   ;;  %vm340_vm3 = vcmask 162816   ;;  %vm401_vm4 = vcmask 1043456  }
   0x8   :  { %130 = vmatpush.msra.mxu1 %v106_v1  ;;  %v104_v5 = vld [vmem:[#allocation3 + $0x28] sm:$0xff]  ;;  %v45_v6 = vld [vmem:[#allocation3] sm:$0xff]  ;;  %v40_v8 = vld [vmem:[%s2131_s0] sm:$0xff]  ;;  %v190_v59 = vshrl.u32 %v189_v56, 7  ;;  %v256_v60 = vand.u32 127, %v189_v56  ;;  %s1646_s10 = smov 24  }
   0x9   :  { %80 = vmatpush.msra.mxu0 %v47_v2  ;;  %v103_v7 = vld [vmem:[#allocation3 + $0x20] sm:$0xff]  ;;  %v99_v9 = vld [vmem:[%s2132_s1] sm:$0xff]  ;;  %v150_v11 = vld [vmem:[#allocation3 + $0x50] sm:$0xff]  ;;  %s1647_s13 = smov [#allocation6]   ;;  %s1390_s16 = sshll.u32 %s2137_s6, 4  ;;  %s1391_s16 = int_to_ptr.hbm [resolvable:$true] %s1390_s16 }
   0xa   :  { %131 = vmatpush.msra.mxu1 %v105_v3  ;;  %v151_v10 = vld [vmem:[#allocation3 + $0x58] sm:$0xff]  ;;  %v149_v12 = vld [vmem:[#allocation3 + $0x48] sm:$0xff]  ;;  %v148_v13 = vld [vmem:[#allocation3 + $0x40] sm:$0xff]  ;;  %v199_v62 = vand.u32 1, %v190_v59  ;;  %v261_v63 = vand.u32 1, %v256_v60  ;;  %v191_v2 = vadd.s32 8, %v190_v59 }
   0xb   :  { %81 = vmatpush.msra.mxu0 %v46_v4  ;;  %175 = vmatpush.msra.mxu2 %v151_v10  ;;  %v41_v14 = vld [vmem:[%s2131_s0 + $0x8] sm:$0xff]  ;;  %v144_v16 = vld [vmem:[%s2133_s2] sm:$0xff]  ;;  %v42_v17 = vld [vmem:[%s2131_s0 + $0x10] sm:$0xff]  ;;  %v192_v10 = vadd.s32 16, %v190_v59  ;;  %s1388_s14 = sshll.u32 %s1647_s13, 4  ;;  %s1389_s14 = int_to_ptr.vmem [resolvable:$true] %s1388_s14 }
   0xc   :  { %132 = vmatpush.msra.mxu1 %v104_v5  ;;  %v100_v15 = vld [vmem:[%s2132_s1 + $0x8] sm:$0xff]  ;;  %v101_v18 = vld [vmem:[%s2132_s1 + $0x10] sm:$0xf]  ;;  %v43_v20 = vld [vmem:[%s2131_s0 + $0x18] sm:$0xff]  ;;  %vm269_vm2 = vcmp.eq.s32.totalorder %v199_v62, %v261_v63 }
   0xd   :  { %82 = vmatpush.msra.mxu0 %v45_v6  ;;  %176 = vmatpush.msra.mxu2 %v150_v11  ;;  %v145_v19 = vld [vmem:[%s2133_s2 + $0x8] sm:$0xff]  ;;  %v146_v21 = vld [vmem:[%s2133_s2 + $0x10] sm:$0xf]  ;;  %v44_v22 = vld [vmem:[%s2131_s0 + $0x20] sm:$0xff]  ;;  %s1642_s2 = smov 120   ;;  %s1643_s0 = smov 112  }
   0xe   :  { %133 = vmatpush.msra.mxu1 %v103_v7  ;;  %1403 = vmatmul.msk.f32.vlgmr.msra.gmra.mxu0 %vm51_vm0, %v40_v8  ;;  %v1503_v23 = vld [vmem:[%s2136_s5 + $0x1] ss:$0 sm:$0xff]  ;;  %v1502_v27 = vld [vmem:[%s2136_s5] ss:$0 sm:$0xff]  ;;  %v1504_v43 = vld [vmem:[%s2136_s5 + $0x2] ss:$0 sm:$0xff] }
   0xf   :  { %1408 = vmatmul.msk.f32.vlgmr.msra.gmra.mxu1 %vm51_vm0, %v99_v9  ;;  %177 = vmatpush.msra.mxu2 %v149_v12  ;;  %v1505_v1 = vld [vmem:[%s2134_s3] ss:$0 sm:$0xff]  ;;  %v206_v6 = vand.u32 1, %v191_v2  ;;  %s1645_s3 = smov 16  }
  0x10   :  { %v1797_v5 = vsel %vm269_vm2, %v1505_v1, -1e+30 }
  0x11   :  { %178 = vmatpush.msra.mxu2 %v148_v13  ;;  %vm270_vm5 = vcmp.eq.s32.totalorder %v206_v6, %v261_v63 }
  0x12   :  { %1411 = vmatmul.msk.f32.vlgmr.msra.gmra.mxu2 %vm51_vm0, %v144_v16  ;;  %v1807_v13 = vsel %vm270_vm5, %v1505_v1, -1e+30 }
  0x16   :  { %1404 = vmatmul.msk.f32.gmra.mxu0 %vm51_vm0, %v41_v14  ;;  %v213_v14 = vand.u32 1, %v192_v10 }
  0x17   :  { %1409 = vmatmul.msk.f32.gmra.mxu1 %vm51_vm0, %v100_v15 }
  0x18   :  { %vm271_vm6 = vcmp.eq.s32.totalorder %v213_v14, %v261_v63 }
  0x1a   :  { %1412 = vmatmul.msk.f32.gmra.mxu2 %vm51_vm0, %v145_v19 }
  0x1e   :  { %1405 = vmatmul.msk.f32.gmra.mxu0 %vm51_vm0, %v42_v17 }
  0x1f   :  { %1410 = vmatmul.msk.f32.gmra.mxu1 %vm51_vm0, %v101_v18 }
  0x22   :  { %1413 = vmatmul.msk.f32.gmra.mxu2 %vm51_vm0, %v146_v21  ;;  %v1816_v21 = vsel %vm271_vm6, %v1505_v1, -1e+30 }
  0x26   :  { %1406 = vmatmul.msk.f32.gmra.mxu0 %vm51_vm0, %v43_v20  ;;  %v193_v20 = vadd.s32 24, %v190_v59 }
  0x2e   :  { %1407 = vmatmul.msk.f32.gmra.mxu0 %vm51_vm0, %v44_v22  ;;  %v220_v22 = vand.u32 1, %v193_v20 }
  0x30   :  { %vm272_vm7 = vcmp.eq.s32.totalorder %v220_v22, %v261_v63 }
  0x8b   :  { %v84_v24 = vpop.f32.mrf.mxu0 }
  0x8c   :  { %v135_v25 = vpop.f32.mrf.mxu1  ;;  %v85_v28 = vadd.f32 %v1502_v27, %v84_v24 }
  0x8d   :  { %v136_v26 = vadd.f32 %v1503_v23, %v135_v25 }
  0x8f   :  { %527 = vrot.lane.b32.xlu1 %v136_v26, %s1642_s2 }
  0x93   :  { %v87_v29 = vpop.f32.mrf.mxu0 }
  0x94   :  { %v138_v30 = vpop.f32.mrf.mxu1  ;;  %v88_v31 = vadd.f32 %v1502_v27, %v87_v29  ;;  %v1824_v29 = vsel %vm272_vm7, %v1505_v1, -1e+30 }
  0x95   :  { %v139_v36 = vadd.f32 %v1503_v23, %v138_v30  ;;  %v180_v41 = vpop.f32.mrf.mxu2 }
  0x96   :  { %519 = vrot.lane.b32.xlu2 %v88_v31, %s1642_s2  ;;  %v181_v46 = vadd.f32 %v1504_v43, %v180_v41 }
  0x97   :  { %517 = vrot.lane.b32.xlu1 %v85_v28, %s1642_s2 }
  0x9b   :  { %v90_v32 = vpop.f32.mrf.mxu0 }
  0x9c   :  { %v141_v33 = vpop.f32.mrf.mxu1  ;;  %v91_v34 = vadd.f32 %v1502_v27, %v90_v32 }
  0x9d   :  { %v142_v35 = vadd.f32 %v1503_v23, %v141_v33  ;;  %v183_v42 = vpop.f32.mrf.mxu2 }
  0x9e   :  { %521 = vrot.lane.b32.xlu2 %v91_v34, %s1642_s2  ;;  %v184_v47 = vadd.f32 %v1504_v43, %v183_v42 }
  0x9f   :  { %531 = vrot.lane.b32.xlu0 %v142_v35, %s1642_s2  ;;  %1414 = vmatpush.xpose.msk.msrb.mxu1 %vm283_vm1, %v142_v35 }
  0xa0   :  { %1475 = vmatpush.xpose.msk.msra.mxu3 %vm283_vm1, %v142_v35  ;;  %800 = vrot.lane.b32.xlu1 %v142_v35, %s1643_s0  ;;  %v1779_v48 = vpack.i.bf16 %v181_v46, %v184_v47 }
  0xa3   :  { %1415 = vmatpush.xpose.msk.msrb.mxu1 %vm283_vm1, %v139_v36  ;;  %v93_v37 = vpop.f32.mrf.mxu0 }
  0xa4   :  { %1476 = vmatpush.xpose.msk.msra.mxu3 %vm283_vm1, %v139_v36  ;;  %v94_v38 = vadd.f32 %v1502_v27, %v93_v37 }
  0xa5   :  { %v186_v44 = vpop.f32.mrf.mxu2 }
  0xa6   :  { %1067 = vrot.lane.b32.xlu2 %v142_v35, %s1644_s29  ;;  %v187_v45 = vadd.f32 %v1504_v43, %v186_v44 }
  0xa7   :  { %529 = vrot.lane.b32.xlu0 %v139_v36, %s1642_s2  ;;  %1416 = vmatpush.xpose.msk.msrb.mxu1 %vm283_vm1, %v136_v26 }
  0xa8   :  { %1477 = vmatpush.xpose.msk.msra.mxu3 %vm283_vm1, %v136_v26  ;;  %798 = vrot.lane.b32.xlu1 %v139_v36, %s1643_s0 }
  0xaa   :  { %1417 = vmatmul.msk.f32.vlgmr.msrb.gmra.mxu1 %vm283_vm1, %v85_v28 }
  0xab   :  { %1418 = vmatmul.msk.f32.vlgmr.msra.gmra.mxu3 %vm283_vm1, %v88_v31  ;;  %v96_v39 = vpop.f32.mrf.mxu0  ;;  %1422 = vmatpush.msk.msra.mxu1 %vm401_vm4, %v187_v45 }
  0xac   :  { %v97_v40 = vadd.f32 %v1502_v27, %v96_v39 }
  0xad   :  { %419 = vmatpush.msra.mxu1 %v184_v47 }
  0xae   :  { %1065 = vrot.lane.b32.xlu2 %v139_v36, %s1644_s29 }
  0xaf   :  { %796 = vrot.lane.b32.xlu0 %v136_v26, %s1643_s0  ;;  %420 = vmatpush.msra.mxu1 %v181_v46 }
  0xb0   :  { %1063 = vrot.lane.b32.xlu1 %v136_v26, %s1644_s29 }
  0xb3   :  { %1419 = vmatmul.msk.f32.gmra.mxu3 %vm283_vm1, %v91_v34 }
  0xb6   :  { %786 = vrot.lane.b32.xlu2 %v85_v28, %s1643_s0 }
  0xb7   :  { %523 = vrot.lane.b32.xlu0 %v94_v38, %s1642_s2 }
  0xb8   :  { %788 = vrot.lane.b32.xlu1 %v88_v31, %s1643_s0 }
  0xbb   :  { %1420 = vmatmul.msk.f32.gmra.mxu3 %vm283_vm1, %v94_v38 }
  0xbe   :  { %1055 = vrot.lane.b32.xlu2 %v88_v31, %s1644_s29 }
  0xbf   :  { %525 = vrot.lane.b32.xlu0 %v97_v40, %s1642_s2 }
  0xc0   :  { %1057 = vrot.lane.b32.xlu1 %v91_v34, %s1644_s29 }
  0xc3   :  { %1421 = vmatmul.msk.f32.gmra.mxu3 %vm283_vm1, %v97_v40 }
  0xc6   :  { %792 = vrot.lane.b32.xlu2 %v94_v38, %s1643_s0 }
  0xc7   :  { %1053 = vrot.lane.b32.xlu0 %v85_v28, %s1644_s29  ;;  %v194_v28 = vadd.s32 32, %v190_v59 }
  0xc8   :  { %794 = vrot.lane.b32.xlu1 %v97_v40, %s1643_s0 }
  0xc9   :  { %v227_v30 = vand.u32 1, %v194_v28 }
  0xcb   :  { %vm273_vm8 = vcmp.eq.s32.totalorder %v227_v30, %v261_v63 }
  0xcc   :  { %v1833_v36 = vsel %vm273_vm8, %v1505_v1, -1e+30 }
  0xce   :  { %1061 = vrot.lane.b32.xlu2 %v97_v40, %s1644_s29 }
  0xcf   :  { %790 = vrot.lane.b32.xlu0 %v91_v34, %s1643_s0 }
  0xd0   :  { %1488 = vrot.lane.b32.xlu1 %v1779_v48, %s1642_s2 }
  0xd6   :  { %632 = vrot.lane.b32.xlu2 %v187_v45, %s1642_s2 }
  0xd7   :  { %1059 = vrot.lane.b32.xlu0 %v94_v38, %s1644_s29 }
  0xd8   :  { %1166 = vrot.lane.b32.xlu1 %v187_v45, %s1644_s29 }
  0xdf   :  { %899 = vrot.lane.b32.xlu0 %v187_v45, %s1643_s0 }
  0xf0   :  { %v520_v49 = vpop.permute.xlu2 %519 }
  0xf8   :  { %v522_v51 = vpop.permute.xlu2 %521 }
 0x100   :  { %v1068_v53 = vpop.permute.xlu2 %1067 }
 0x101   :  { %v528_v50 = vpop.permute.xlu1 %527 }
 0x108   :  { %v1066_v58 = vpop.permute.xlu2 %1065 }
 0x109   :  { %v518_v52 = vpop.permute.xlu1 %517 }
 0x110   :  { %v787_v4 = vpop.permute.xlu2 %786 }
 0x111   :  { %v532_v54 = vpop.permute.xlu0 %531 }
 0x112   :  { %1428 = vmatpush.xpose.msk.msrb.mxu2 %vm283_vm1, %v532_v54  ;;  %v801_v55 = vpop.permute.xlu1 %800 }
 0x113   :  { %1442 = vmatpush.xpose.msk.msrb.mxu3 %vm283_vm1, %v801_v55 }
 0x118   :  { %v1056_v17 = vpop.permute.xlu2 %1055 }
 0x119   :  { %v530_v57 = vpop.permute.xlu0 %529 }
 0x11a   :  { %1429 = vmatpush.xpose.msk.msrb.mxu2 %vm283_vm1, %v530_v57  ;;  %v799_v61 = vpop.permute.xlu1 %798 }
 0x11b   :  { %1443 = vmatpush.xpose.msk.msrb.mxu3 %vm283_vm1, %v799_v61 }
 0x11e   :  { %1430 = vmatpush.xpose.msk.msrb.mxu2 %vm283_vm1, %v528_v50 }
 0x120   :  { %v793_v25 = vpop.permute.xlu2 %792 }
 0x121   :  { %v797_v0 = vpop.permute.xlu0 %796  ;;  %1431 = vmatmul.msk.f32.vlgmr.msrb.gmra.mxu2 %vm283_vm1, %v518_v52 }
 0x122   :  { %1456 = vmatpush.xpose.msk.msra.mxu2 %vm283_vm1, %v1068_v53  ;;  %1444 = vmatpush.xpose.msk.msrb.mxu3 %vm283_vm1, %v797_v0  ;;  %v1064_v3 = vpop.permute.xlu1 %1063 }
 0x125   :  { %1445 = vmatmul.msk.f32.vlgmr.msrb.gmra.mxu3 %vm283_vm1, %v787_v4 }
 0x126   :  { %1457 = vmatpush.xpose.msk.msra.mxu2 %vm283_vm1, %v1066_v58 }
 0x127   :  { %v325_v7 = vpop.f32.mrf.mxu1 }
 0x128   :  { %v1801_v8 = vadd.f32 %v325_v7, %v1797_v5  ;;  %v1062_v35 = vpop.permute.xlu2 %1061 }
 0x129   :  { %v524_v9 = vpop.permute.xlu0 %523  ;;  %1432 = vmatmul.msk.f32.gmra.mxu2 %vm283_vm1, %v520_v49 }
 0x12a   :  { %1458 = vmatpush.xpose.msk.msra.mxu2 %vm283_vm1, %v1064_v3  ;;  %v341_v11 = vsel %vm340_vm3, %v1801_v8, -inf  ;;  %v789_v12 = vpop.permute.xlu1 %788 }
 0x12b   :  { %342 = vmax.xlane.f32.xlu0 %v341_v11 }
 0x12d   :  { %1446 = vmatmul.msk.f32.gmra.mxu3 %vm283_vm1, %v789_v12 }
 0x12e   :  { %v328_v15 = vpop.f32.mrf.mxu3 }
 0x12f   :  { %v1811_v16 = vadd.f32 %v328_v15, %v1807_v13 }
 0x130   :  { %v633_v42 = vpop.permute.xlu2 %632 }
 0x131   :  { %v526_v18 = vpop.permute.xlu0 %525  ;;  %v344_v19 = vsel %vm340_vm3, %v1811_v16, -inf  ;;  %1433 = vmatmul.msk.f32.gmra.mxu2 %vm283_vm1, %v522_v51  ;;  %1436 = vmatpush.msk.msrb.mxu0 %vm401_vm4, %v633_v42 }
 0x132   :  { %345 = vmax.xlane.f32.xlu2 %v344_v19  ;;  %v1058_v39 = vpop.permute.xlu1 %1057 }
 0x136   :  { %v331_v23 = vpop.f32.mrf.mxu3 }
 0x137   :  { %v1819_v24 = vadd.f32 %v331_v23, %v1816_v21 }
 0x139   :  { %v1054_v26 = vpop.permute.xlu0 %1053  ;;  %1434 = vmatmul.msk.f32.gmra.mxu2 %vm283_vm1, %v524_v9  ;;  %v347_v27 = vsel %vm340_vm3, %v1819_v24, -inf }
 0x13a   :  { %348 = vmax.xlane.f32.xlu0 %v347_v27  ;;  %v795_v43 = vpop.permute.xlu1 %794 }
 0x13e   :  { %v334_v31 = vpop.f32.mrf.mxu3 }
 0x13f   :  { %v1827_v32 = vadd.f32 %v334_v31, %v1824_v29 }
 0x141   :  { %v791_v33 = vpop.permute.xlu0 %790  ;;  %v350_v34 = vsel %vm340_vm3, %v1827_v32, -inf  ;;  %1435 = vmatmul.msk.f32.gmra.mxu2 %vm283_vm1, %v526_v18 }
 0x142   :  { %351 = vmax.xlane.f32.xlu2 %v350_v34  ;;  %1447 = vmatmul.msk.f32.gmra.mxu3 %vm283_vm1, %v791_v33  ;;  %v1489_v45 = vpop.permute.xlu1 %1488 }
 0x143   :  { %v1490_v49 = vunpack.i.l.bf16 %v1489_v45  ;;  %v1491_v51 = vunpack.i.h.bf16 %v1489_v45 }
 0x145   :  { %667 = vmatpush.msrb.mxu0 %v1490_v49 }
 0x146   :  { %v337_v37 = vpop.f32.mrf.mxu3 }
 0x147   :  { %v1836_v38 = vadd.f32 %v337_v37, %v1833_v36  ;;  %668 = vmatpush.msrb.mxu0 %v1491_v51 }
 0x149   :  { %v1060_v40 = vpop.permute.xlu0 %1059  ;;  %v353_v41 = vsel %vm340_vm3, %v1836_v38, -inf  ;;  %1459 = vmatmul.msk.f32.vlgmr.msra.gmra.mxu2 %vm283_vm1, %v1054_v26 }
 0x14a   :  { %354 = vmax.xlane.f32.xlu1 %v353_v41  ;;  %1448 = vmatmul.msk.f32.gmra.mxu3 %vm283_vm1, %v793_v25  ;;  %v1167_v52 = vpop.permute.xlu1 %1166 }
 0x14b   :  { %1464 = vmatpush.msk.msra.mxu0 %vm401_vm4, %v1167_v52 }
 0x151   :  { %1460 = vmatmul.msk.f32.gmra.mxu2 %vm283_vm1, %v1056_v17  ;;  %v900_v44 = vpop.permute.xlu0 %899 }
 0x152   :  { %1449 = vmatmul.msk.f32.gmra.mxu3 %vm283_vm1, %v795_v43  ;;  %1450 = vmatpush.msk.msrb.mxu1 %vm401_vm4, %v900_v44 }
 0x159   :  { %1461 = vmatmul.msk.f32.gmra.mxu2 %vm283_vm1, %v1058_v39 }
 0x15a   :  { %1493 = vrot.lane.b32.xlu2 %v1779_v48, %s1643_s0 }
 0x161   :  { %1462 = vmatmul.msk.f32.gmra.mxu2 %vm283_vm1, %v1060_v40 }
 0x169   :  { %1463 = vmatmul.msk.f32.gmra.mxu2 %vm283_vm1, %v1062_v35 }
 0x19e   :  { %v343_v46 = vpop.xlane.xlu0 %342 }
 0x19f   :  { %v356_v47 = vsub.f32 %v1801_v8, %v343_v46 }
 0x1a1   :  { %v361_v50 = vmul.f32 1.442695, %v356_v47 }
 0x1a3   :  { %1507 = vpow2.f32 %v361_v50 }
 0x1a4   :  { %v566_v53 = vpop.f32.mrf.mxu2 }
 0x1a5   :  { %v346_v54 = vpop.xlane.xlu2 %345  ;;  %v1854_v55 = vadd.f32 %v566_v53, %v1797_v5 }
 0x1a6   :  { %v357_v56 = vsub.f32 %v1811_v16, %v346_v54 }
 0x1a7   :  { %v581_v57 = vsel %vm340_vm3, %v1854_v55, -inf }
 0x1a8   :  { %v363_v58 = vmul.f32 1.442695, %v357_v56  ;;  %582 = vmax.xlane.f32.xlu1 %v581_v57  ;;  %v835_v59 = vpop.f32.mrf.mxu3 }
 0x1a9   :  { %v1859_v60 = vpop.eup %1507  ;;  %v1862_v61 = vadd.f32 %v835_v59, %v1797_v5 }
 0x1aa   :  { %1423 = vmatmul.msk.f32.vlgmr.msra.gmra.mxu1 %vm340_vm3, %v1859_v60  ;;  %1509 = vpow2.f32 %v363_v58  ;;  %v371_v58 = vsel %vm340_vm3, %v1859_v60, 0.0 }
 0x1ab   :  { %v850_v62 = vsel %vm340_vm3, %v1862_v61, -inf }
 0x1ac   :  { %v569_v63 = vpop.f32.mrf.mxu2  ;;  %851 = vmax.xlane.f32.xlu0 %v850_v62 }
 0x1ad   :  { %v349_v0 = vpop.xlane.xlu0 %348  ;;  %v1870_v2 = vadd.f32 %v569_v63, %v1807_v13 }
 0x1ae   :  { %v358_v1 = vsub.f32 %v1819_v24, %v349_v0 }
 0x1af   :  { %v584_v9 = vsel %vm340_vm3, %v1870_v2, -inf }
 0x1b0   :  { %v365_v3 = vmul.f32 1.442695, %v358_v1  ;;  %v838_v4 = vpop.f32.mrf.mxu3  ;;  %v1872_v6 = vpop.eup %1509 }
 0x1b1   :  { %v1875_v7 = vadd.f32 %v838_v4, %v1807_v13 }
 0x1b2   :  { %1424 = vmatmul.msk.f32.gmra.mxu1 %vm340_vm3, %v1872_v6  ;;  %1511 = vpow2.f32 %v365_v3 }
 0x1b3   :  { %v853_v8 = vsel %vm340_vm3, %v1875_v7, -inf }
 0x1b4   :  { %v572_v10 = vpop.f32.mrf.mxu2  ;;  %854 = vmax.xlane.f32.xlu2 %v853_v8  ;;  %585 = vmax.xlane.f32.xlu0 %v584_v9 }
 0x1b5   :  { %v352_v11 = vpop.xlane.xlu2 %351  ;;  %v1885_v14 = vadd.f32 %v572_v10, %v1816_v21 }
 0x1b6   :  { %v359_v12 = vsub.f32 %v1827_v32, %v352_v11 }
 0x1b7   :  { %v587_v17 = vsel %vm340_vm3, %v1885_v14, -inf }
 0x1b8   :  { %v367_v15 = vmul.f32 1.442695, %v359_v12  ;;  %v1512_v16 = vpop.eup %1511 }
 0x1b9   :  { %v377_v57 = vsel %vm340_vm3, %v1512_v16, 0.0 }
 0x1ba   :  { %1425 = vmatmul.msk.f32.gmra.mxu1 %vm340_vm3, %v1512_v16  ;;  %1513 = vpow2.f32 %v367_v15 }
 0x1bc   :  { %v575_v18 = vpop.f32.mrf.mxu2  ;;  %588 = vmax.xlane.f32.xlu0 %v587_v17 }
 0x1bd   :  { %v1494_v19 = vpop.permute.xlu2 %1493  ;;  %v1891_v20 = vadd.f32 %v575_v18, %v1824_v29  ;;  %v355_v22 = vpop.xlane.xlu1 %354 }
 0x1be   :  { %v1495_v23 = vunpack.i.l.bf16 %v1494_v19  ;;  %v360_v24 = vsub.f32 %v1836_v38, %v355_v22  ;;  %v1496_v25 = vunpack.i.h.bf16 %v1494_v19 }
 0x1bf   :  { %v590_v27 = vsel %vm340_vm3, %v1891_v20, -inf }
 0x1c0   :  { %v369_v26 = vmul.f32 1.442695, %v360_v24  ;;  %934 = vmatpush.msrb.mxu1 %v1495_v23  ;;  %v1898_v28 = vpop.eup %1513 }
 0x1c1   :  { %1498 = vrot.lane.b32.xlu1 %v1779_v48, %s1644_s29 }
 0x1c2   :  { %935 = vmatpush.msrb.mxu1 %v1496_v25  ;;  %1515 = vpow2.f32 %v369_v26 }
 0x1c3   :  { %1426 = vmatmul.msk.f32.gmra.mxu1 %vm340_vm3, %v1898_v28 }
 0x1c4   :  { %v578_v30 = vpop.f32.mrf.mxu2  ;;  %591 = vmax.xlane.f32.xlu0 %v590_v27 }
 0x1c5   :  { %v1903_v31 = vadd.f32 %v578_v30, %v1833_v36  ;;  %v841_v32 = vpop.f32.mrf.mxu3 }
 0x1c6   :  { %v1906_v33 = vadd.f32 %v841_v32, %v1816_v21 }
 0x1c7   :  { %v593_v34 = vsel %vm340_vm3, %v1903_v31, -inf }
 0x1c8   :  { %v856_v48 = vsel %vm340_vm3, %v1906_v33, -inf  ;;  %v1912_v35 = vpop.eup %1515 }
 0x1c9   :  { %857 = vmax.xlane.f32.xlu2 %v856_v48 }
 0x1cb   :  { %1427 = vmatmul.msk.f32.gmra.mxu1 %vm340_vm3, %v1912_v35 }
 0x1cc   :  { %v1102_v37 = vpop.f32.mrf.mxu2  ;;  %594 = vmax.xlane.f32.xlu0 %v593_v34 }
 0x1cd   :  { %v1917_v38 = vadd.f32 %v1102_v37, %v1797_v5  ;;  %v844_v43 = vpop.f32.mrf.mxu3 }
 0x1ce   :  { %v1927_v45 = vadd.f32 %v844_v43, %v1824_v29 }
 0x1cf   :  { %v1117_v39 = vsel %vm340_vm3, %v1917_v38, -inf }
 0x1d0   :  { %v859_v5 = vsel %vm340_vm3, %v1927_v45, -inf }
 0x1d4   :  { %v1105_v40 = vpop.f32.mrf.mxu2  ;;  %1118 = vmax.xlane.f32.xlu0 %v1117_v39 }
 0x1d5   :  { %v1922_v41 = vadd.f32 %v1105_v40, %v1807_v13  ;;  %v847_v51 = vpop.f32.mrf.mxu3 }
 0x1d6   :  { %v1945_v54 = vadd.f32 %v847_v51, %v1833_v36 }
 0x1d7   :  { %v1120_v42 = vsel %vm340_vm3, %v1922_v41, -inf }
 0x1d8   :  { %v862_v56 = vsel %vm340_vm3, %v1945_v54, -inf }
 0x1dc   :  { %v1108_v44 = vpop.f32.mrf.mxu2  ;;  %1121 = vmax.xlane.f32.xlu0 %v1120_v42 }
 0x1dd   :  { %v1932_v47 = vadd.f32 %v1108_v44, %v1816_v21 }
 0x1df   :  { %v1123_v49 = vsel %vm340_vm3, %v1932_v47, -inf }
 0x1e4   :  { %v1111_v46 = vpop.f32.mrf.mxu2  ;;  %860 = vmax.xlane.f32.xlu0 %v859_v5 }
 0x1e5   :  { %v1935_v13 = vadd.f32 %v1111_v46, %v1824_v29  ;;  %v374_v29 = vsel %vm340_vm3, %v1872_v6, 0.0 }
 0x1e7   :  { %v1126_v50 = vsel %vm340_vm3, %v1935_v13, -inf }
 0x1eb   :  { %1124 = vmax.xlane.f32.xlu1 %v1123_v49 }
 0x1ec   :  { %v1114_v52 = vpop.f32.mrf.mxu2  ;;  %1127 = vmax.xlane.f32.xlu0 %v1126_v50 }
 0x1ed   :  { %v1942_v53 = vadd.f32 %v1114_v52, %v1833_v36 }
 0x1ef   :  { %v1129_v21 = vsel %vm340_vm3, %v1942_v53, -inf }
 0x1f0   :  { %1130 = vmax.xlane.f32.xlu2 %v1129_v21 }
 0x1f3   :  { %375 = vadd.xlane.f32.xlu1 %v374_v29 }
 0x1f4   :  { %863 = vmax.xlane.f32.xlu0 %v862_v56 }
 0x1f8   :  { %378 = vadd.xlane.f32.xlu2 %v377_v57 }
 0x1fc   :  { %372 = vadd.xlane.f32.xlu0 %v371_v58 }
 0x21b   :  { %v583_v36 = vpop.xlane.xlu1 %582 }
 0x21c   :  { %v596_v59 = vsub.f32 %v1854_v55, %v583_v36 }
 0x21e   :  { %v601_v62 = vmul.f32 1.442695, %v596_v59 }
 0x21f   :  { %v852_v63 = vpop.xlane.xlu0 %851 }
 0x220   :  { %1517 = vpow2.f32 %v601_v62  ;;  %v865_v0 = vsub.f32 %v1862_v61, %v852_v63 }
 0x222   :  { %v870_v1 = vmul.f32 1.442695, %v865_v0 }
 0x224   :  { %1519 = vpow2.f32 %v870_v1 }
 0x226   :  { %v1518_v3 = vpop.eup %1517 }
 0x227   :  { %v855_v4 = vpop.xlane.xlu2 %854  ;;  %1437 = vmatmul.msk.f32.vlgmr.msrb.gmra.mxu0 %vm340_vm3, %v1518_v3  ;;  %v611_v6 = vsel %vm340_vm3, %v1518_v3, 0.0  ;;  %v586_v60 = vpop.xlane.xlu0 %585 }
 0x228   :  { %v866_v8 = vsub.f32 %v1875_v7, %v855_v4  ;;  %612 = vadd.xlane.f32.xlu0 %v611_v6  ;;  %v597_v9 = vsub.f32 %v1870_v2, %v586_v60  ;;  %v1991_v6 = vpop.f32.mrf.mxu1 }
 0x22a   :  { %v1520_v55 = vpop.eup %1519  ;;  %v872_v10 = vmul.f32 1.442695, %v866_v8  ;;  %v603_v11 = vmul.f32 1.442695, %v597_v9 }
 0x22b   :  { %1451 = vmatmul.msk.f32.vlgmr.msrb.gmra.mxu1 %vm340_vm3, %v1520_v55  ;;  %v880_v61 = vsel %vm340_vm3, %v1520_v55, 0.0 }
 0x22c   :  { %1521 = vpow2.f32 %v872_v10  ;;  %881 = vadd.xlane.f32.xlu1 %v880_v61 }
 0x22d   :  { %1523 = vpow2.f32 %v603_v11 }
 0x22f   :  { %v589_v12 = vpop.xlane.xlu0 %588 }
 0x230   :  { %v598_v15 = vsub.f32 %v1885_v14, %v589_v12 }
 0x232   :  { %v1522_v16 = vpop.eup %1521  ;;  %v605_v7 = vmul.f32 1.442695, %v598_v15 }
 0x233   :  { %v1524_v17 = vpop.eup %1523  ;;  %v1499_v18 = vpop.permute.xlu1 %1498  ;;  %1452 = vmatmul.msk.f32.gmra.mxu1 %vm340_vm3, %v1522_v16  ;;  %v883_v2 = vsel %vm340_vm3, %v1522_v16, 0.0 }
 0x234   :  { %v1500_v19 = vunpack.i.l.bf16 %v1499_v18  ;;  %1438 = vmatmul.msk.f32.gmra.mxu0 %vm340_vm3, %v1524_v17  ;;  %884 = vadd.xlane.f32.xlu1 %v883_v2  ;;  %v614_v22 = vsel %vm340_vm3, %v1524_v17, 0.0  ;;  %1525 = vpow2.f32 %v605_v7  ;;  %v1501_v23 = vunpack.i.h.bf16 %v1499_v18 }
 0x235   :  { %615 = vadd.xlane.f32.xlu0 %v614_v22 }
 0x236   :  { %1201 = vmatpush.msra.mxu0 %v1500_v19 }
 0x237   :  { %v592_v24 = vpop.xlane.xlu0 %591 }
 0x238   :  { %1202 = vmatpush.msra.mxu0 %v1501_v23  ;;  %v599_v14 = vsub.f32 %v1891_v20, %v592_v24 }
 0x23a   :  { %v1526_v25 = vpop.eup %1525  ;;  %v607_v26 = vmul.f32 1.442695, %v599_v14 }
 0x23b   :  { %v617_v30 = vsel %vm340_vm3, %v1526_v25, 0.0 }
 0x23c   :  { %1439 = vmatmul.msk.f32.gmra.mxu0 %vm340_vm3, %v1526_v25  ;;  %v858_v27 = vpop.xlane.xlu2 %857  ;;  %1527 = vpow2.f32 %v607_v26 }
 0x23d   :  { %v867_v32 = vsub.f32 %v1906_v33, %v858_v27  ;;  %618 = vadd.xlane.f32.xlu0 %v617_v30 }
 0x23f   :  { %v874_v48 = vmul.f32 1.442695, %v867_v32  ;;  %v595_v34 = vpop.xlane.xlu0 %594 }
 0x240   :  { %v600_v37 = vsub.f32 %v1903_v31, %v595_v34 }
 0x241   :  { %1529 = vpow2.f32 %v874_v48 }
 0x242   :  { %v1528_v39 = vpop.eup %1527  ;;  %v609_v40 = vmul.f32 1.442695, %v600_v37 }
 0x243   :  { %v620_v20 = vsel %vm340_vm3, %v1528_v39, 0.0 }
 0x244   :  { %1440 = vmatmul.msk.f32.gmra.mxu0 %vm340_vm3, %v1528_v39  ;;  %1531 = vpow2.f32 %v609_v40 }
 0x245   :  { %621 = vadd.xlane.f32.xlu0 %v620_v20 }
 0x247   :  { %v1530_v42 = vpop.eup %1529  ;;  %v1119_v43 = vpop.xlane.xlu0 %1118 }
 0x248   :  { %1453 = vmatmul.msk.f32.gmra.mxu1 %vm340_vm3, %v1530_v42  ;;  %v886_v33 = vsel %vm340_vm3, %v1530_v42, 0.0  ;;  %v1132_v44 = vsub.f32 %v1917_v38, %v1119_v43 }
 0x249   :  { %887 = vadd.xlane.f32.xlu1 %v886_v33 }
 0x24a   :  { %v1532_v5 = vpop.eup %1531  ;;  %v1137_v46 = vmul.f32 1.442695, %v1132_v44 }
 0x24b   :  { %v623_v31 = vsel %vm340_vm3, %v1532_v5, 0.0 }
 0x24c   :  { %1441 = vmatmul.msk.f32.gmra.mxu0 %vm340_vm3, %v1532_v5  ;;  %1533 = vpow2.f32 %v1137_v46 }
 0x24d   :  { %624 = vadd.xlane.f32.xlu0 %v623_v31 }
 0x24f   :  { %v1122_v49 = vpop.xlane.xlu0 %1121 }
 0x250   :  { %v1133_v50 = vsub.f32 %v1922_v41, %v1122_v49 }
 0x252   :  { %v1534_v51 = vpop.eup %1533  ;;  %v1139_v52 = vmul.f32 1.442695, %v1133_v50 }
 0x253   :  { %v1147_v21 = vsel %vm340_vm3, %v1534_v51, 0.0 }
 0x254   :  { %1465 = vmatmul.msk.f32.vlgmr.msra.gmra.mxu0 %vm340_vm3, %v1534_v51  ;;  %1535 = vpow2.f32 %v1139_v52  ;;  %1148 = vadd.xlane.f32.xlu2 %v1147_v21 }
 0x257   :  { %v861_v38 = vpop.xlane.xlu0 %860 }
 0x258   :  { %v868_v29 = vsub.f32 %v1927_v45, %v861_v38 }
 0x25a   :  { %v1536_v56 = vpop.eup %1535  ;;  %v876_v57 = vmul.f32 1.442695, %v868_v29 }
 0x25b   :  { %v1150_v58 = vsel %vm340_vm3, %v1536_v56, 0.0 }
 0x25c   :  { %1466 = vmatmul.msk.f32.gmra.mxu0 %vm340_vm3, %v1536_v56  ;;  %1537 = vpow2.f32 %v876_v57  ;;  %1151 = vadd.xlane.f32.xlu2 %v1150_v58 }
 0x25e   :  { %v1125_v41 = vpop.xlane.xlu1 %1124 }
 0x25f   :  { %v1134_v36 = vsub.f32 %v1932_v47, %v1125_v41  ;;  %v1128_v59 = vpop.xlane.xlu0 %1127 }
 0x260   :  { %v1135_v63 = vsub.f32 %v1935_v13, %v1128_v59 }
 0x261   :  { %v1141_v62 = vmul.f32 1.442695, %v1134_v36 }
 0x262   :  { %v1538_v0 = vpop.eup %1537  ;;  %v1143_v3 = vmul.f32 1.442695, %v1135_v63 }
 0x263   :  { %1539 = vpow2.f32 %v1141_v62  ;;  %v1131_v1 = vpop.xlane.xlu2 %1130  ;;  %1454 = vmatmul.msk.f32.gmra.mxu1 %vm340_vm3, %v1538_v0  ;;  %v889_v45 = vsel %vm340_vm3, %v1538_v0, 0.0 }
 0x264   :  { %890 = vadd.xlane.f32.xlu1 %v889_v45  ;;  %v1136_v8 = vsub.f32 %v1942_v53, %v1131_v1 }
 0x266   :  { %v376_v4 = vpop.xlane.xlu1 %375  ;;  %v1145_v11 = vmul.f32 1.442695, %v1136_v8 }
 0x267   :  { %1541 = vrcp.f32 %v376_v4  ;;  %v864_v47 = vpop.xlane.xlu0 %863  ;;  %v462_v17 = vand.u32 2147483648, %v376_v4  ;;  %v460_v2 = vand.u32 2147483647, %v376_v4  ;;  %vm456_vm10 = vweird.f32 %v376_v4 }
 0x268   :  { %1543 = vpow2.f32 %v1143_v3  ;;  %v869_v13 = vsub.f32 %v1945_v54, %v864_v47  ;;  %v425_v54 = vpop.f32.mrf.mxu1 }
 0x269   :  { %v1540_v60 = vpop.eup %1539  ;;  %v463_v25 = vor.u32 1.1754944e-38, %v462_v17  ;;  %vm461_vm12 = vcmp.eq.f32.partialorder %v460_v2, 8.507059e+37 }
 0x26a   :  { %1467 = vmatmul.msk.f32.gmra.mxu0 %vm340_vm3, %v1540_v60  ;;  %v1153_v9 = vsel %vm340_vm3, %v1540_v60, 0.0  ;;  %v878_v55 = vmul.f32 1.442695, %v869_v13 }
 0x26b   :  { %v379_v10 = vpop.xlane.xlu2 %378  ;;  %1154 = vadd.xlane.f32.xlu2 %v1153_v9 }
 0x26c   :  { %1545 = vrcp.f32 %v379_v10  ;;  %v476_v32 = vand.u32 2147483648, %v379_v10  ;;  %v474_v39 = vand.u32 2147483647, %v379_v10  ;;  %vm470_vm14 = vweird.f32 %v379_v10 }
 0x26d   :  { %v1542_v61 = vpop.eup %1541  ;;  %1547 = vpow2.f32 %v878_v55 }
 0x26e   :  { %v452_v12 = vmul.f32 %v1542_v61, %v376_v4  ;;  %v1544_v15 = vpop.eup %1543  ;;  %1549 = vpow2.f32 %v1145_v11  ;;  %vm457_vm9 = vweird.f32 %v1542_v61  ;;  %v477_v43 = vor.u32 1.1754944e-38, %v476_v32 }
 0x26f   :  { %v373_v16 = vpop.xlane.xlu0 %372  ;;  %v1156_v19 = vsel %vm340_vm3, %v1544_v15, 0.0  ;;  %vm458_vm11 = vmor %vm456_vm10, %vm457_vm9  ;;  %vm475_vm2 = vcmp.eq.f32.partialorder %v474_v39, 8.507059e+37 }
 0x270   :  { %v453_v53 = vsub.f32 1.0, %v452_v12  ;;  %1551 = vrcp.f32 %v373_v16  ;;  %v448_v46 = vand.u32 2147483648, %v373_v16  ;;  %v428_v31 = vpop.f32.mrf.mxu1  ;;  %v446_v51 = vand.u32 2147483647, %v373_v16 }
 0x271   :  { %vm442_vm5 = vweird.f32 %v373_v16 }
 0x272   :  { %v1546_v7 = vpop.eup %1545  ;;  %v454_v18 = vmul.f32 %v1542_v61, %v453_v53  ;;  %1468 = vmatmul.msk.f32.gmra.mxu0 %vm340_vm3, %v1544_v15  ;;  %v449_v38 = vor.u32 1.1754944e-38, %v448_v46  ;;  %vm447_vm7 = vcmp.eq.f32.partialorder %v446_v51, 8.507059e+37 }
 0x273   :  { %v1548_v22 = vpop.eup %1547  ;;  %v466_v23 = vmul.f32 %v1546_v7, %v379_v10  ;;  %1157 = vadd.xlane.f32.xlu2 %v1156_v19  ;;  %vm471_vm13 = vweird.f32 %v1546_v7 }
 0x274   :  { %v455_v24 = vadd.f32 %v1542_v61, %v454_v18  ;;  %1455 = vmatmul.msk.f32.gmra.mxu1 %vm340_vm3, %v1548_v22  ;;  %v892_v14 = vsel %vm340_vm3, %v1548_v22, 0.0  ;;  %v1550_v27 = vpop.eup %1549  ;;  %vm472_vm15 = vmor %vm470_vm14, %vm471_vm13 }
 0x275   :  { %v467_v26 = vsub.f32 1.0, %v466_v23  ;;  %893 = vadd.xlane.f32.xlu1 %v892_v14  ;;  %v1159_v44 = vsel %vm340_vm3, %v1550_v27, 0.0 }
 0x276   :  { %v459_v30 = vsel %vm458_vm11, %v1542_v61, %v455_v24  ;;  %v1552_v48 = vpop.eup %1551 }
 0x277   :  { %v464_v34 = vsel %vm461_vm12, %v463_v25, %v459_v30  ;;  %v468_v37 = vmul.f32 %v1546_v7, %v467_v26  ;;  %v438_v40 = vmul.f32 %v1552_v48, %v373_v16  ;;  %vm443_vm4 = vweird.f32 %v1552_v48 }
 0x278   :  { %v508_v20 = vmul.f32 %v464_v34, %v425_v54  ;;  %vm444_vm6 = vmor %vm442_vm5, %vm443_vm4  ;;  %v2007_v41 = vpop.f32.mrf.mxu1 }
 0x279   :  { %v469_v42 = vadd.f32 %v1546_v7, %v468_v37  ;;  %v439_v33 = vsub.f32 1.0, %v438_v40 }
 0x27a   :  { %1469 = vmatmul.msk.f32.gmra.mxu0 %vm340_vm3, %v1550_v27  ;;  %513 = vst.msk [vmem:[#allocation2 + $0x8] sm:$0xff] %vm283_vm1, %v508_v20 }
 0x27b   :  { %v473_v5 = vsel %vm472_vm15, %v1546_v7, %v469_v42  ;;  %1160 = vadd.xlane.f32.xlu2 %v1159_v44  ;;  %v440_v50 = vmul.f32 %v1552_v48, %v439_v33 }
 0x27c   :  { %v478_v49 = vsel %vm475_vm2, %v477_v43, %v473_v5 }
 0x27d   :  { %v509_v52 = vmul.f32 %v478_v49, %v428_v31  ;;  %v441_v21 = vadd.f32 %v1552_v48, %v440_v50 }
 0x27f   :  { %514 = vst.msk [vmem:[#allocation2 + $0x10] sm:$0xff] %vm283_vm1, %v509_v52  ;;  %v445_v29 = vsel %vm444_vm6, %v1552_v48, %v441_v21 }
 0x280   :  { %v450_v56 = vsel %vm447_vm7, %v449_v38, %v445_v29  ;;  %v2009_v1 = vpop.f32.mrf.mxu1 }
 0x281   :  { %v507_v57 = vmul.f32 %v450_v56, %v1991_v6 }
 0x283   :  { %512 = vst.msk [vmem:[#allocation2] sm:$0xff] %vm283_vm1, %v507_v57 }
 0x29b   :  { %v613_v58 = vpop.xlane.xlu0 %612 }
 0x29c   :  { %1553 = vrcp.f32 %v613_v58  ;;  %v694_v45 = vand.u32 2147483647, %v613_v58  ;;  %v696_v3 = vand.u32 2147483648, %v613_v58  ;;  %vm690_vm9 = vweird.f32 %v613_v58 }
 0x29e   :  { %vm695_vm11 = vcmp.eq.f32.partialorder %v694_v45, 8.507059e+37  ;;  %v697_v55 = vor.u32 1.1754944e-38, %v696_v3 }
 0x29f   :  { %v882_v36 = vpop.xlane.xlu1 %881 }
 0x2a0   :  { %1555 = vrcp.f32 %v882_v36  ;;  %v963_v10 = vand.u32 2147483648, %v882_v36  ;;  %v961_v12 = vand.u32 2147483647, %v882_v36  ;;  %vm957_vm13 = vweird.f32 %v882_v36 }
 0x2a2   :  { %v1554_v59 = vpop.eup %1553  ;;  %v964_v54 = vor.u32 1.1754944e-38, %v963_v10  ;;  %vm962_vm15 = vcmp.eq.f32.partialorder %v961_v12, 8.507059e+37 }
 0x2a3   :  { %v686_v62 = vmul.f32 %v1554_v59, %v613_v58  ;;  %vm691_vm8 = vweird.f32 %v1554_v59 }
 0x2a4   :  { %v670_v13 = vpop.f32.mrf.mxu0  ;;  %vm692_vm10 = vmor %vm690_vm9, %vm691_vm8 }
 0x2a5   :  { %v687_v63 = vsub.f32 1.0, %v686_v62 }
 0x2a6   :  { %v1556_v0 = vpop.eup %1555 }
 0x2a7   :  { %v953_v4 = vmul.f32 %v1556_v0, %v882_v36  ;;  %v688_v8 = vmul.f32 %v1554_v59, %v687_v63  ;;  %v885_v6 = vpop.xlane.xlu1 %884  ;;  %vm958_vm12 = vweird.f32 %v1556_v0 }
 0x2a8   :  { %1557 = vrcp.f32 %v885_v6  ;;  %v616_v47 = vpop.xlane.xlu0 %615  ;;  %v937_v7 = vpop.f32.mrf.mxu1  ;;  %vm959_vm14 = vmor %vm957_vm13, %vm958_vm12  ;;  %v977_v30 = vand.u32 2147483648, %v885_v6  ;;  %v975_v34 = vand.u32 2147483647, %v885_v6  ;;  %vm971_vm5 = vweird.f32 %v885_v6 }
 0x2a9   :  { %v954_v60 = vsub.f32 1.0, %v953_v4  ;;  %v689_v9 = vadd.f32 %v1554_v59, %v688_v8  ;;  %1559 = vrcp.f32 %v616_v47  ;;  %v710_v32 = vand.u32 2147483648, %v616_v47 }
 0x2aa   :  { %v708_v39 = vand.u32 2147483647, %v616_v47  ;;  %vm704_vm6 = vweird.f32 %v616_v47  ;;  %v978_v42 = vor.u32 1.1754944e-38, %v977_v30  ;;  %vm976_vm9 = vcmp.eq.f32.partialorder %v975_v34, 8.507059e+37 }
 0x2ab   :  { %v693_v11 = vsel %vm692_vm10, %v1554_v59, %v689_v9  ;;  %v955_v61 = vmul.f32 %v1556_v0, %v954_v60  ;;  %v711_v33 = vor.u32 1.1754944e-38, %v710_v32  ;;  %v380_v30 = vsel %vm340_vm3, %v1898_v28, 0.0 }
 0x2ac   :  { %v698_v15 = vsel %vm695_vm11, %v697_v55, %v693_v11  ;;  %vm709_vm10 = vcmp.eq.f32.partialorder %v708_v39, 8.507059e+37 }
 0x2ad   :  { %v755_v53 = vmul.f32 %v698_v15, %v670_v13  ;;  %v956_v16 = vadd.f32 %v1556_v0, %v955_v61 }
 0x2ae   :  { %v1558_v17 = vpop.eup %1557 }
 0x2af   :  { %v1560_v18 = vpop.eup %1559  ;;  %v967_v2 = vmul.f32 %v1558_v17, %v885_v6  ;;  %v960_v19 = vsel %vm959_vm14, %v1556_v0, %v956_v16  ;;  %765 = vrot.lane.b32.xlu0 %v755_v53, %s1641_s27  ;;  %vm972_vm2 = vweird.f32 %v1558_v17 }
 0x2b0   :  { %v700_v22 = vmul.f32 %v1560_v18, %v616_v47  ;;  %v965_v23 = vsel %vm962_vm15, %v964_v54, %v960_v19  ;;  %v619_v24 = vpop.xlane.xlu0 %618  ;;  %vm705_vm4 = vweird.f32 %v1560_v18  ;;  %vm973_vm7 = vmor %vm971_vm5, %vm972_vm2  ;;  %v940_v31 = vpop.f32.mrf.mxu1 }
 0x2b1   :  { %v968_v14 = vsub.f32 1.0, %v967_v2  ;;  %v1022_v25 = vmul.f32 %v965_v23, %v937_v7  ;;  %1561 = vrcp.f32 %v619_v24  ;;  %v673_v26 = vpop.f32.mrf.mxu0  ;;  %vm706_vm8 = vmor %vm704_vm6, %vm705_vm4  ;;  %v724_v29 = vand.u32 2147483648, %v619_v24 }
 0x2b2   :  { %v701_v27 = vsub.f32 1.0, %v700_v22  ;;  %v722_v57 = vand.u32 2147483647, %v619_v24  ;;  %vm718_vm12 = vweird.f32 %v619_v24 }
 0x2b3   :  { %v969_v48 = vmul.f32 %v1558_v17, %v968_v14  ;;  %1032 = vrot.lane.b32.xlu1 %v1022_v25, %s1645_s3  ;;  %v725_v59 = vor.u32 1.1754944e-38, %v724_v29 }
 0x2b4   :  { %v702_v37 = vmul.f32 %v1560_v18, %v701_v27  ;;  %vm723_vm14 = vcmp.eq.f32.partialorder %v722_v57, 8.507059e+37 }
 0x2b5   :  { %v970_v40 = vadd.f32 %v1558_v17, %v969_v48 }
 0x2b6   :  { %v703_v20 = vadd.f32 %v1560_v18, %v702_v37 }
 0x2b7   :  { %v1562_v43 = vpop.eup %1561  ;;  %v974_v44 = vsel %vm973_vm7, %v1558_v17, %v970_v40 }
 0x2b8   :  { %v714_v5 = vmul.f32 %v1562_v43, %v619_v24  ;;  %v707_v46 = vsel %vm706_vm8, %v1560_v18, %v703_v20  ;;  %v979_v49 = vsel %vm976_vm9, %v978_v42, %v974_v44  ;;  %vm719_vm11 = vweird.f32 %v1562_v43  ;;  %v2018_v6 = vpop.xlane.xlu0 %621 }
 0x2b9   :  { %v712_v50 = vsel %vm709_vm10, %v711_v33, %v707_v46  ;;  %v1023_v51 = vmul.f32 %v979_v49, %v940_v31  ;;  %v676_v38 = vpop.f32.mrf.mxu0  ;;  %vm720_vm13 = vmor %vm718_vm12, %vm719_vm11  ;;  %vm732_vm11 = vweird.f32 %v2018_v6  ;;  %v738_v44 = vand.u32 2147483648, %v2018_v6 }
 0x2ba   :  { %v715_v52 = vsub.f32 1.0, %v714_v5  ;;  %v756_v21 = vmul.f32 %v712_v50, %v673_v26  ;;  %v736_v46 = vand.u32 2147483647, %v2018_v6 }
 0x2bb   :  { %1034 = vrot.lane.b32.xlu2 %v1023_v51, %s1645_s3 }
 0x2bc   :  { %v716_v56 = vmul.f32 %v1562_v43, %v715_v52  ;;  %767 = vrot.lane.b32.xlu1 %v756_v21, %s1641_s27  ;;  %v888_v58 = vpop.xlane.xlu1 %887 }
 0x2bd   :  { %1563 = vrcp.f32 %v888_v58  ;;  %v991_v47 = vand.u32 2147483648, %v888_v58  ;;  %v989_v13 = vand.u32 2147483647, %v888_v58  ;;  %vm985_vm2 = vweird.f32 %v888_v58 }
 0x2be   :  { %v717_v36 = vadd.f32 %v1562_v43, %v716_v56  ;;  %v739_v56 = vor.u32 1.1754944e-38, %v738_v44 }
 0x2bf   :  { %v992_v10 = vor.u32 1.1754944e-38, %v991_v47  ;;  %vm990_vm5 = vcmp.eq.f32.partialorder %v989_v13, 8.507059e+37 }
 0x2c0   :  { %v721_v62 = vsel %vm720_vm13, %v1562_v43, %v717_v36 }
 0x2c1   :  { %v726_v63 = vsel %vm723_vm14, %v725_v59, %v721_v62  ;;  %v2016_v4 = vpop.f32.mrf.mxu0  ;;  %vm737_vm14 = vcmp.eq.f32.partialorder %v736_v46, 8.507059e+37 }
 0x2c2   :  { %v757_v0 = vmul.f32 %v726_v63, %v676_v38 }
 0x2c3   :  { %v1564_v45 = vpop.eup %1563 }
 0x2c4   :  { %v981_v3 = vmul.f32 %v1564_v45, %v888_v58  ;;  %769 = vrot.lane.b32.xlu1 %v757_v0, %s1641_s27  ;;  %vm986_vm15 = vweird.f32 %v1564_v45 }
 0x2c5   :  { %vm987_vm4 = vmor %vm985_vm2, %vm986_vm15  ;;  %v943_v61 = vpop.f32.mrf.mxu1 }
 0x2c6   :  { %v982_v8 = vsub.f32 1.0, %v981_v3 }
 0x2c7   :  { %v1149_v9 = vpop.xlane.xlu2 %1148 }
 0x2c8   :  { %v983_v60 = vmul.f32 %v1564_v45, %v982_v8  ;;  %1565 = vrcp.f32 %v1149_v9  ;;  %v1230_v19 = vand.u32 2147483648, %v1149_v9  ;;  %v1228_v23 = vand.u32 2147483647, %v1149_v9 }
 0x2c9   :  { %1567 = vrcp.f32 %v2018_v6  ;;  %v2021_v16 = vpop.f32.mrf.mxu0  ;;  %vm1224_vm7 = vweird.f32 %v1149_v9 }
 0x2ca   :  { %v984_v55 = vadd.f32 %v1564_v45, %v983_v60  ;;  %v1231_v25 = vor.u32 1.1754944e-38, %v1230_v19  ;;  %vm1229_vm9 = vcmp.eq.f32.partialorder %v1228_v23, 8.507059e+37 }
 0x2cc   :  { %v988_v11 = vsel %vm987_vm4, %v1564_v45, %v984_v55 }
 0x2cd   :  { %v993_v12 = vsel %vm990_vm5, %v992_v10, %v988_v11 }
 0x2ce   :  { %v1024_v15 = vmul.f32 %v993_v12, %v943_v61  ;;  %v1566_v53 = vpop.eup %1565 }
 0x2cf   :  { %v1568_v17 = vpop.eup %1567  ;;  %v1220_v7 = vmul.f32 %v1566_v53, %v1149_v9  ;;  %v2023_v54 = vpop.xlane.xlu2 %1151  ;;  %vm1225_vm6 = vweird.f32 %v1566_v53 }
 0x2d0   :  { %1036 = vrot.lane.b32.xlu1 %v1024_v15, %s1645_s3  ;;  %v728_v2 = vmul.f32 %v1568_v17, %v2018_v6  ;;  %1569 = vrcp.f32 %v2023_v54  ;;  %vm1226_vm8 = vmor %vm1224_vm7, %vm1225_vm6  ;;  %vm733_vm10 = vweird.f32 %v1568_v17  ;;  %v1244_v8 = vand.u32 2147483648, %v2023_v54 }
 0x2d1   :  { %v1221_v18 = vsub.f32 1.0, %v1220_v7  ;;  %v1204_v48 = vpop.f32.mrf.mxu0  ;;  %vm2040_vm12 = vmor %vm732_vm11, %vm733_vm10  ;;  %vm1238_vm6 = vweird.f32 %v2023_v54  ;;  %v1242_v60 = vand.u32 2147483647, %v2023_v54 }
 0x2d2   :  { %v729_v14 = vsub.f32 1.0, %v728_v2  ;;  %v1245_v12 = vor.u32 1.1754944e-38, %v1244_v8 }
 0x2d3   :  { %v1222_v22 = vmul.f32 %v1566_v53, %v1221_v18 }
 0x2d4   :  { %v730_v39 = vmul.f32 %v1568_v17, %v729_v14 }
 0x2d5   :  { %v1223_v24 = vadd.f32 %v1566_v53, %v1222_v22 }
 0x2d6   :  { %v2030_v32 = vpop.eup %1569  ;;  %v731_v43 = vadd.f32 %v1568_v17, %v730_v39 }
 0x2d7   :  { %v1227_v26 = vsel %vm1226_vm8, %v1566_v53, %v1223_v24  ;;  %v891_v27 = vpop.xlane.xlu1 %890  ;;  %v1234_v40 = vmul.f32 %v2030_v32, %v2023_v54  ;;  %vm1239_vm2 = vweird.f32 %v2030_v32  ;;  %vm1243_vm8 = vcmp.eq.f32.partialorder %v1242_v60, 8.507059e+37 }
 0x2d8   :  { %v1232_v34 = vsel %vm1229_vm9, %v1231_v25, %v1227_v26  ;;  %1571 = vrcp.f32 %v891_v27  ;;  %v735_v49 = vsel %vm2040_vm12, %v1568_v17, %v731_v43  ;;  %v1005_v51 = vand.u32 2147483648, %v891_v27  ;;  %vm1240_vm7 = vmor %vm1238_vm6, %vm1239_vm2 }
 0x2d9   :  { %381 = vadd.xlane.f32.xlu0 %v380_v30  ;;  %v1289_v37 = vmul.f32 %v1232_v34, %v1204_v48  ;;  %v1235_v28 = vsub.f32 1.0, %v1234_v40  ;;  %v1207_v50 = vpop.f32.mrf.mxu0  ;;  %v1003_v38 = vand.u32 2147483647, %v891_v27  ;;  %vm999_vm15 = vweird.f32 %v891_v27 }
 0x2da   :  { %v740_v59 = vsel %vm737_vm14, %v739_v56, %v735_v49  ;;  %v1006_v62 = vor.u32 1.1754944e-38, %v1005_v51 }
 0x2db   :  { %1299 = vrot.lane.b32.xlu2 %v1289_v37, %s1646_s10  ;;  %v1236_v52 = vmul.f32 %v2030_v32, %v1235_v28  ;;  %vm1004_vm5 = vcmp.eq.f32.partialorder %v1003_v38, 8.507059e+37  ;;  %v758_v9 = vmul.f32 %v740_v59, %v2016_v4  ;;  %v383_v59 = vsel %vm340_vm3, %v1912_v35, 0.0 }
 0x2dd   :  { %v1237_v63 = vadd.f32 %v2030_v32, %v1236_v52 }
 0x2de   :  { %v2035_v20 = vpop.xlane.xlu2 %1154  ;;  %v1572_v42 = vpop.eup %1571 }
 0x2df   :  { %1573 = vrcp.f32 %v2035_v20  ;;  %v995_v33 = vmul.f32 %v1572_v42, %v891_v27  ;;  %vm1000_vm13 = vweird.f32 %v1572_v42  ;;  %v1241_v10 = vsel %vm1240_vm7, %v2030_v32, %v1237_v63  ;;  %v625_v32 = vpop.xlane.xlu0 %624 }
 0x2e0   :  { %vm1001_vm4 = vmor %vm999_vm15, %vm1000_vm13  ;;  %v946_v6 = vpop.f32.mrf.mxu1  ;;  %v1246_v4 = vsel %vm1243_vm8, %v1245_v12, %v1241_v10  ;;  %v1258_v18 = vand.u32 2147483648, %v2035_v20  ;;  %vm1252_vm10 = vweird.f32 %v2035_v20  ;;  %v1256_v19 = vand.u32 2147483647, %v2035_v20  ;;  %v1329_v10 = vld [vmem:[#allocation3 + $0x78] sm:$0xff] }
 0x2e1   :  { %v996_v31 = vsub.f32 1.0, %v995_v33  ;;  %v1290_v2 = vmul.f32 %v1246_v4, %v1207_v50  ;;  %v752_v60 = vand.u32 2147483648, %v625_v32  ;;  %1359 = vmatpush.msra.mxu3 %v1329_v10 }
 0x2e2   :  { %v1259_v25 = vor.u32 1.1754944e-38, %v1258_v18  ;;  %vm1257_vm12 = vcmp.eq.f32.partialorder %v1256_v19, 8.507059e+37 }
 0x2e3   :  { %v997_v21 = vmul.f32 %v1572_v42, %v996_v31 }
 0x2e5   :  { %v1574_v29 = vpop.eup %1573  ;;  %v998_v58 = vadd.f32 %v1572_v42, %v997_v21 }
 0x2e6   :  { %v1248_v57 = vmul.f32 %v1574_v29, %v2035_v20  ;;  %v2049_v36 = vpop.xlane.xlu2 %1157  ;;  %vm1253_vm9 = vweird.f32 %v1574_v29 }
 0x2e7   :  { %1575 = vrcp.f32 %v2049_v36  ;;  %v1002_v45 = vsel %vm1001_vm4, %v1572_v42, %v998_v58  ;;  %v1210_v55 = vpop.f32.mrf.mxu0  ;;  %vm1254_vm11 = vmor %vm1252_vm10, %vm1253_vm9  ;;  %vm1266_vm14 = vweird.f32 %v2049_v36  ;;  %v1270_v39 = vand.u32 2147483647, %v2049_v36 }
 0x2e8   :  { %v1249_v0 = vsub.f32 1.0, %v1248_v57  ;;  %v2054_v3 = vpop.xlane.xlu1 %893  ;;  %v1007_v47 = vsel %vm1004_vm5, %v1006_v62, %v1002_v45  ;;  %v1272_v40 = vand.u32 2147483648, %v2049_v36 }
 0x2e9   :  { %v1025_v13 = vmul.f32 %v1007_v47, %v946_v6  ;;  %1577 = vrcp.f32 %v2054_v3  ;;  %vm1271_vm6 = vcmp.eq.f32.partialorder %v1270_v39, 8.507059e+37  ;;  %v1019_v56 = vand.u32 2147483648, %v2054_v3 }
 0x2ea   :  { %v1250_v11 = vmul.f32 %v1574_v29, %v1249_v0  ;;  %v1273_v46 = vor.u32 1.1754944e-38, %v1272_v40  ;;  %vm1013_vm9 = vweird.f32 %v2054_v3  ;;  %v1017_v58 = vand.u32 2147483647, %v2054_v3 }
 0x2eb   :  { %1038 = vrot.lane.b32.xlu1 %v1025_v13, %s1645_s3  ;;  %v1020_v63 = vor.u32 1.1754944e-38, %v1019_v56  ;;  %v750_v13 = vand.u32 2147483647, %v625_v32 }
 0x2ec   :  { %v1251_v7 = vadd.f32 %v1574_v29, %v1250_v11  ;;  %v1328_v11 = vld [vmem:[#allocation3 + $0x70] sm:$0xff] }
 0x2ed   :  { %v1576_v61 = vpop.eup %1575  ;;  %771 = vrot.lane.b32.xlu0 %v758_v9, %s1641_s27  ;;  %vm751_vm3 = vcmp.eq.f32.partialorder %v750_v13, 8.507059e+37  ;;  %1360 = vmatpush.msra.mxu3 %v1328_v11 }
 0x2ee   :  { %v1262_v15 = vmul.f32 %v1576_v61, %v2049_v36  ;;  %v1161_v53 = vpop.xlane.xlu2 %1160  ;;  %v1255_v22 = vsel %vm1254_vm11, %v1574_v29, %v1251_v7  ;;  %vm1267_vm13 = vweird.f32 %v1576_v61  ;;  %vm1018_vm11 = vcmp.eq.f32.partialorder %v1017_v58, 8.507059e+37 }
 0x2ef   :  { %1579 = vrcp.f32 %v1161_v53  ;;  %v2067_v54 = vpop.eup %1577  ;;  %v1213_v26 = vpop.f32.mrf.mxu0  ;;  %v1260_v30 = vsel %vm1257_vm12, %v1259_v25, %v1255_v22  ;;  %v1286_v20 = vand.u32 2147483648, %v1161_v53  ;;  %v1284_v28 = vand.u32 2147483647, %v1161_v53  ;;  %vm1268_vm2 = vmor %vm1266_vm14, %vm1267_vm13 }
 0x2f0   :  { %v1263_v17 = vsub.f32 1.0, %v1262_v15  ;;  %v1009_v23 = vmul.f32 %v2067_v54, %v2054_v3  ;;  %v1291_v42 = vmul.f32 %v1260_v30, %v1210_v55  ;;  %1581 = vrcp.f32 %v625_v32  ;;  %v1326_v15 = vld [vmem:[#allocation3 + $0x60] sm:$0xff] }
 0x2f1   :  { %vm1280_vm4 = vweird.f32 %v1161_v53  ;;  %v1287_v31 = vor.u32 1.1754944e-38, %v1286_v20  ;;  %vm1285_vm7 = vcmp.eq.f32.partialorder %v1284_v28, 8.507059e+37  ;;  %vm1014_vm8 = vweird.f32 %v2067_v54  ;;  %v949_v8 = vpop.f32.mrf.mxu1 }
 0x2f2   :  { %v1264_v24 = vmul.f32 %v1576_v61, %v1263_v17  ;;  %v1010_v48 = vsub.f32 1.0, %v1009_v23  ;;  %vm1015_vm10 = vmor %vm1013_vm9, %vm1014_vm8  ;;  %vm746_vm13 = vweird.f32 %v625_v32  ;;  %v753_v55 = vor.u32 1.1754944e-38, %v752_v60 }
 0x2f3   :  { %1301 = vrot.lane.b32.xlu1 %v1290_v2, %s1646_s10 }
 0x2f4   :  { %v1265_v37 = vadd.f32 %v1576_v61, %v1264_v24  ;;  %v1011_v44 = vmul.f32 %v2067_v54, %v1010_v48 }
 0x2f5   :  { %v1580_v14 = vpop.eup %1579 }
 0x2f6   :  { %v1276_v27 = vmul.f32 %v1580_v14, %v1161_v53  ;;  %vm1281_vm15 = vweird.f32 %v1580_v14  ;;  %v1269_v33 = vsel %vm1268_vm2, %v1576_v61, %v1265_v37  ;;  %v1012_v21 = vadd.f32 %v2067_v54, %v1011_v44  ;;  %v1582_v29 = vpop.eup %1581  ;;  %v1327_v61 = vld [vmem:[#allocation3 + $0x68] sm:$0xff] }
 0x2f7   :  { %vm1282_vm5 = vmor %vm1280_vm4, %vm1281_vm15  ;;  %v1274_v50 = vsel %vm1271_vm6, %v1273_v46, %v1269_v33  ;;  %v1216_v51 = vpop.f32.mrf.mxu0  ;;  %v742_v62 = vmul.f32 %v1582_v29, %v625_v32  ;;  %vm747_vm12 = vweird.f32 %v1582_v29  ;;  %1361 = vmatpush.msra.mxu3 %v1327_v61  ;;  %vm780_vm15 = vcmask 130112  }
 0x2f8   :  { %v1277_v34 = vsub.f32 1.0, %v1276_v27  ;;  %v1292_v57 = vmul.f32 %v1274_v50, %v1213_v26  ;;  %v1016_v36 = vsel %vm1015_vm10, %v2067_v54, %v1012_v21  ;;  %vm748_vm14 = vmor %vm746_vm13, %vm747_vm12  ;;  %vm1047_vm2 = vcmask 195712  }
 0x2f9   :  { %v1021_v0 = vsel %vm1018_vm11, %v1020_v63, %v1016_v36  ;;  %v743_v45 = vsub.f32 1.0, %v742_v62  ;;  %1362 = vmatpush.msra.mxu3 %v1326_v15  ;;  %vm1314_vm4 = vcmask 261312  }
 0x2fa   :  { %v1278_v43 = vmul.f32 %v1580_v14, %v1277_v34  ;;  %v1026_v6 = vmul.f32 %v1021_v0, %v949_v8 }
 0x2fb   :  { %1303 = vrot.lane.b32.xlu1 %v1291_v42, %s1646_s10  ;;  %v744_v3 = vmul.f32 %v1582_v29, %v743_v45 }
 0x2fc   :  { %v1279_v5 = vadd.f32 %v1580_v14, %v1278_v43 }
 0x2fd   :  { %v745_v47 = vadd.f32 %v1582_v29, %v744_v3 }
 0x2fe   :  { %v1283_v49 = vsel %vm1282_vm5, %v1580_v14, %v1279_v5 }
 0x2ff   :  { %v1288_v52 = vsel %vm1285_vm7, %v1287_v31, %v1283_v49  ;;  %v749_v9 = vsel %vm748_vm14, %v1582_v29, %v745_v47 }
 0x300   :  { %v1293_v38 = vmul.f32 %v1288_v52, %v1216_v51  ;;  %v754_v35 = vsel %vm751_vm3, %v753_v55, %v749_v9 }
 0x301   :  { %v759_v12 = vmul.f32 %v754_v35, %v2021_v16 }
 0x302   :  { %1307 = vrot.lane.b32.xlu0 %v1293_v38, %s1646_s10 }
 0x303   :  { %1305 = vrot.lane.b32.xlu1 %v1292_v57, %s1646_s10 }
 0x304   :  { %384 = vadd.xlane.f32.xlu2 %v383_v59  ;;  %v1506_v59 = vld [vmem:[%s2136_s5 + $0x3] ss:$0 sm:$0xff] }
 0x30b   :  { %1040 = vrot.lane.b32.xlu1 %v1026_v6, %s1645_s3 }
 0x315   :  { %v1035_v17 = vpop.permute.xlu2 %1034 }
 0x31c   :  { %773 = vrot.lane.b32.xlu2 %v759_v12, %s1641_s27 }
 0x321   :  { %v766_v53 = vpop.permute.xlu0 %765 }
 0x322   :  { %781 = vst.msk [vmem:[#allocation2] sm:$0xff] %vm780_vm15, %v766_v53 }
 0x325   :  { %v1033_v4 = vpop.permute.xlu1 %1032 }
 0x326   :  { %1048 = vst.msk [vmem:[#allocation2] sm:$0xff] %vm1047_vm2, %v1033_v4 }
 0x32e   :  { %v768_v7 = vpop.permute.xlu1 %767 }
 0x32f   :  { %782 = vst.msk [vmem:[#allocation2 + $0x8] sm:$0xff] %vm780_vm15, %v768_v7 }
 0x330   :  { %1049 = vst.msk [vmem:[#allocation2 + $0x8] sm:$0xff] %vm1047_vm2, %v1035_v17 }
 0x335   :  { %v1300_v16 = vpop.permute.xlu2 %1299 }
 0x336   :  { %v770_v54 = vpop.permute.xlu1 %769  ;;  %1315 = vst.msk [vmem:[#allocation2] sm:$0xff] %vm1314_vm4, %v1300_v16 }
 0x337   :  { %783 = vst.msk [vmem:[#allocation2 + $0x10] sm:$0xff] %vm780_vm15, %v770_v54 }
 0x33d   :  { %v1320_v18 = vld [vmem:[#allocation2] sm:$0xff] }
 0x33e   :  { %1470 = vmatmul.msk.f32.vlgmr.msra.gmra.mxu3 %vm51_vm0, %v1320_v18 }
 0x342   :  { %v1037_v2 = vpop.permute.xlu1 %1036 }
 0x343   :  { %1050 = vst.msk [vmem:[#allocation2 + $0x10] sm:$0xff] %vm1047_vm2, %v1037_v2 }
 0x34c   :  { %v382_v19 = vpop.xlane.xlu0 %381 }
 0x34d   :  { %1583 = vrcp.f32 %v382_v19  ;;  %v490_v14 = vand.u32 2147483648, %v382_v19  ;;  %v488_v26 = vand.u32 2147483647, %v382_v19  ;;  %vm484_vm6 = vweird.f32 %v382_v19 }
 0x34f   :  { %v491_v30 = vor.u32 1.1754944e-38, %v490_v14  ;;  %vm489_vm8 = vcmp.eq.f32.partialorder %v488_v26, 8.507059e+37 }
 0x353   :  { %v1584_v22 = vpop.eup %1583 }
 0x354   :  { %v480_v23 = vmul.f32 %v1584_v22, %v382_v19  ;;  %vm485_vm5 = vweird.f32 %v1584_v22 }
 0x355   :  { %vm486_vm7 = vmor %vm484_vm6, %vm485_vm5 }
 0x356   :  { %v481_v24 = vsub.f32 1.0, %v480_v23 }
 0x358   :  { %v482_v25 = vmul.f32 %v1584_v22, %v481_v24 }
 0x35a   :  { %v483_v27 = vadd.f32 %v1584_v22, %v482_v25 }
 0x35c   :  { %v487_v32 = vsel %vm486_vm7, %v1584_v22, %v483_v27 }
 0x35d   :  { %v492_v48 = vsel %vm489_vm8, %v491_v30, %v487_v32  ;;  %v1039_v34 = vpop.permute.xlu1 %1038 }
 0x35e   :  { %v510_v37 = vmul.f32 %v492_v48, %v2007_v41 }
 0x35f   :  { %v772_v39 = vpop.permute.xlu0 %771 }
 0x360   :  { %515 = vst.msk [vmem:[#allocation2 + $0x18] sm:$0xff] %vm283_vm1, %v510_v37 }
 0x361   :  { %784 = vst.msk [vmem:[#allocation2 + $0x18] sm:$0xff] %vm780_vm15, %v772_v39 }
 0x362   :  { %1051 = vst.msk [vmem:[#allocation2 + $0x18] sm:$0xff] %vm1047_vm2, %v1039_v34 }
 0x365   :  { %v1302_v40 = vpop.permute.xlu1 %1301 }
 0x366   :  { %1316 = vst.msk [vmem:[#allocation2 + $0x8] sm:$0xff] %vm1314_vm4, %v1302_v40 }
 0x36d   :  { %v1304_v20 = vpop.permute.xlu1 %1303  ;;  %v1321_v42 = vld [vmem:[#allocation2 + $0x8] sm:$0xff] }
 0x36e   :  { %1317 = vst.msk [vmem:[#allocation2 + $0x10] sm:$0xff] %vm1314_vm4, %v1304_v20  ;;  %1471 = vmatmul.msk.f32.gmra.mxu3 %vm51_vm0, %v1321_v42 }
 0x374   :  { %v1308_v58 = vpop.permute.xlu0 %1307 }
 0x375   :  { %v1306_v43 = vpop.permute.xlu1 %1305  ;;  %v1322_v28 = vld [vmem:[#allocation2 + $0x10] sm:$0xff] }
 0x376   :  { %1318 = vst.msk [vmem:[#allocation2 + $0x18] sm:$0xff] %vm1314_vm4, %v1306_v43  ;;  %1472 = vmatmul.msk.f32.gmra.mxu3 %vm51_vm0, %v1322_v28 }
 0x377   :  { %v385_v41 = vpop.xlane.xlu2 %384 }
 0x378   :  { %1585 = vrcp.f32 %v385_v41  ;;  %v504_v31 = vand.u32 2147483648, %v385_v41  ;;  %v502_v50 = vand.u32 2147483647, %v385_v41  ;;  %vm498_vm10 = vweird.f32 %v385_v41 }
 0x37a   :  { %v505_v52 = vor.u32 1.1754944e-38, %v504_v31  ;;  %vm503_vm12 = vcmp.eq.f32.partialorder %v502_v50, 8.507059e+37 }
 0x37d   :  { %v1323_v33 = vld [vmem:[#allocation2 + $0x18] sm:$0xff]  ;;  %v1041_v57 = vpop.permute.xlu1 %1040 }
 0x37e   :  { %v1586_v44 = vpop.eup %1585  ;;  %1473 = vmatmul.msk.f32.gmra.mxu3 %vm51_vm0, %v1323_v33 }
 0x37f   :  { %v494_v5 = vmul.f32 %v1586_v44, %v385_v41  ;;  %vm499_vm9 = vweird.f32 %v1586_v44  ;;  %v774_v56 = vpop.permute.xlu2 %773 }
 0x380   :  { %vm500_vm11 = vmor %vm498_vm10, %vm499_vm9 }
 0x381   :  { %v495_v46 = vsub.f32 1.0, %v494_v5 }
 0x383   :  { %v496_v49 = vmul.f32 %v1586_v44, %v495_v46 }
 0x385   :  { %v497_v51 = vadd.f32 %v1586_v44, %v496_v49 }
 0x387   :  { %v501_v21 = vsel %vm500_vm11, %v1586_v44, %v497_v51 }
 0x388   :  { %v506_v38 = vsel %vm503_vm12, %v505_v52, %v501_v21 }
 0x389   :  { %v511_v29 = vmul.f32 %v506_v38, %v2009_v1 }
 0x38b   :  { %516 = vst.msk [vmem:[#allocation2 + $0x20] sm:$0xff] %vm283_vm1, %v511_v29 }
 0x38c   :  { %785 = vst.msk [vmem:[#allocation2 + $0x20] sm:$0xff] %vm780_vm15, %v774_v56 }
 0x38d   :  { %1052 = vst.msk [vmem:[#allocation2 + $0x20] sm:$0xff] %vm1047_vm2, %v1041_v57 }
 0x38e   :  { %1319 = vst.msk [vmem:[#allocation2 + $0x20] sm:$0xff] %vm1314_vm4, %v1308_v58 }
 0x395   :  { %v1324_v36 = vld [vmem:[#allocation2 + $0x20] sm:$0xff] }
 0x396   :  { %1474 = vmatmul.msk.f32.gmra.mxu3 %vm51_vm0, %v1324_v36 }
 0x3c1   :  { %v1364_v62 = vpop.f32.mrf.mxu3 }
 0x3c2   :  { %v1365_v1 = vadd.f32 %v1506_v59, %v1364_v62 }
 0x3c4   :  { %1379 = vst.msk [vmem:[#allocation6] sm:$0xff] %vm51_vm0, %v1365_v1 }
 0x3f1   :  { %v1367_v63 = vpop.f32.mrf.mxu3 }
 0x3f2   :  { %v1368_v0 = vadd.f32 %v1506_v59, %v1367_v63 }
 0x3f4   :  { %1380 = vst.msk [vmem:[#allocation6 + $0x8] sm:$0xff] %vm51_vm0, %v1368_v0 }
 0x3f9   :  { %v1370_v45 = vpop.f32.mrf.mxu3 }
 0x3fa   :  { %v1371_v8 = vadd.f32 %v1506_v59, %v1370_v45 }
 0x3fc   :  { %1381 = vst.msk [vmem:[#allocation6 + $0x10] sm:$0xff] %vm51_vm0, %v1371_v8 }
 0x401   :  { %v1373_v6 = vpop.f32.mrf.mxu3 }
 0x402   :  { %v1374_v3 = vadd.f32 %v1506_v59, %v1373_v6 }
 0x404   :  { %1382 = vst.msk [vmem:[#allocation6 + $0x18] sm:$0xff] %vm51_vm0, %v1374_v3 }
 0x419   :  { %v1376_v47 = vpop.f32.mrf.mxu3 }
 0x41a   :  { %v1377_v60 = vadd.f32 %v1506_v59, %v1376_v47 }
 0x41c   :  { %1383 = vst.msk [vmem:[#allocation6 + $0x20] sm:$0xff] %vm51_vm0, %v1377_v60 }
 0x41d   :  { %1396 = dma.vmem_to_hbm [thread:$0]  %s1389_s14, 640, %s1391_s16, [#allocation5], %s1640_s26, %s1640_s26, %s1641_s27  }
 0x41e   :  { %1637 = dma.done.wait [#allocation5], 640  }
 0x41f   :  { %1638 = vsyncadd [#allocation5], 4294966656 }
 0x420   :  { %1401 = vsyncpa [#allocation4], 1 }
 0x421   :  { %1402 = vsyncpa [#allocation5], 1 }

</bundles_post_ra>
